<compile_context>
chip_gen: v7x
topology: tpu7x:2x2x1
jax: 0.10.0
libtpu: 0.0.40
codegen_flags: <defaults>
</compile_context>

<pallas_src>
import math

import jax
import jax.numpy as jnp
from jax import lax
from jax.experimental import pallas as pl
from jax.experimental.pallas import tpu as pltpu


_INV_SQRT2 = 1.0 / math.sqrt(2.0)


def _round_up(x, m):
    return ((x + m - 1) // m) * m


def _exact_gelu(x):
    # PyTorch nn.GELU() default (approximate='none'): 0.5*x*(1+erf(x/sqrt(2)))
    return 0.5 * x * (1.0 + lax.erf(x * _INV_SQRT2))


def _tanh_gelu(x):
    # EUP-routed tanh approximation (cheaper when VALU-bound, ~1e-3 shift).
    return jax.nn.gelu(x, approximate=True)


def _make_decoder_kernel(num_layers, approximate_gelu):
    act = _tanh_gelu if approximate_gelu else _exact_gelu

    def kernel(z_ref, *refs):
        # refs = (w1, b1, w2, b2, ..., wL, bL, o_ref)
        o_ref = refs[-1]
        params = refs[:-1]
        x = z_ref[...]                        # (in_dim, block_m) f32, lane-dense
        for i in range(num_layers):
            w = params[2 * i][...]            # (out_i, in_i)  -- PyTorch order
            b = params[2 * i + 1][...]        # (out_i, 1), broadcasts over lanes
            y = jnp.dot(w, x, preferred_element_type=jnp.float32) + b
            x = act(y)                        # (out_i, block_m)
        # Transpose the final tile on the XLU (free while the GELU polynomial
        # saturates the VALU) and store batch-major: removes the wrapper-side
        # .T, which was an extra HBM read+write pass over the whole output.
        # Note: this makes the store out_dim-lane masked (vst.msk); fine on
        # v6e/v7x (1+1 vst slots, hidden under VALU).  On v5e (1 vst slot)
        # prefer consuming the (out_dim, N) layout downstream instead.
        o_ref[...] = x.T.astype(o_ref.dtype)

    return kernel


def decoder_forward(z, weights, biases, *, block_m=None, approximate_gelu=False):
    """Fused MLP decoder forward.

    z:        (N, 2) float32
    weights:  list of (out_i, in_i) float32 arrays (PyTorch nn.Linear layout)
    biases:   list of (out_i,) float32 arrays
    returns:  (N, out_L) float32
    """
    num_layers = len(weights)
    assert num_layers >= 1, "decoder needs at least one Linear layer"
    n, in_dim = z.shape
    out_dim = weights[-1].shape[0]

    if block_m is None:
        # Amortize grid-step overhead with a big tile, but keep n_blocks >= 2
        # whenever N allows it so the "parallel" grid axis can shard across
        # v7x's two TensorCores.  Cap at 2048 to bound padding waste / vreg
        # pressure; VMEM is a non-issue at this size on all generations.
        block_m = max(128, min(2048, _round_up(pl.cdiv(n, 2), 128)))
    assert block_m % 128 == 0, "block_m must be a multiple of 128 (lane width)"

    n_blocks = pl.cdiv(n, block_m)

    # Batch onto the 128-lane axis.  (2, N) is only 8N bytes; no explicit
    # jnp.pad -- Pallas pads the ragged last block (garbage lanes never mix
    # across columns and are clipped by the masked output writeback).
    zT = z.T                                           # (in_dim, N)

    # Biases as (out, 1) so they broadcast over the lane (batch) axis.
    biases_2d = [b.reshape(-1, 1) for b in biases]

    # BlockSpecs: batch-tiled lane-dense input, batch-major tiled output,
    # full-array resident params (constant (0,0) index_map => no re-DMA
    # across batch grid steps).
    z_spec = pl.BlockSpec((in_dim, block_m), lambda i: (0, i))
    out_spec = pl.BlockSpec((block_m, out_dim), lambda i: (i, 0))

    param_specs = []
    param_args = []
    for w, b in zip(weights, biases_2d):
        param_specs.append(pl.BlockSpec(w.shape, lambda i: (0, 0)))
        param_specs.append(pl.BlockSpec(b.shape, lambda i: (0, 0)))
        param_args.append(w)
        param_args.append(b)

    kernel = _make_decoder_kernel(num_layers, approximate_gelu)

    out = pl.pallas_call(
        kernel,
        out_shape=jax.ShapeDtypeStruct((n, out_dim), jnp.float32),
        grid_spec=pltpu.PrefetchScalarGridSpec(
            num_scalar_prefetch=0,
            grid=(n_blocks,),
            in_specs=[z_spec] + param_specs,
            out_specs=out_spec,
        ),
        compiler_params=pltpu.CompilerParams(
            dimension_semantics=("parallel",),
        ),
    )(zT, *param_args)

    return out                                         # (N, out_L), no extra .T


def init_decoder_params(key, hidden_sizes):
    """Deterministic init mimicking nn.Linear default: U(-1/sqrt(in), 1/sqrt(in)).

    Weights stored in PyTorch (out_features, in_features) order.
    """
    sizes = [2] + list(hidden_sizes)
    weights, biases = [], []
    for i in range(len(sizes) - 1):
        fan_in, fan_out = sizes[i], sizes[i + 1]
        key, kw, kb = jax.random.split(key, 3)
        bound = 1.0 / math.sqrt(fan_in)
        w = jax.random.uniform(kw, (fan_out, fan_in), jnp.float32, -bound, bound)
        b = jax.random.uniform(kb, (fan_out,), jnp.float32, -bound, bound)
        weights.append(w)
        biases.append(b)
    return weights, biases


def decoder_reference(z, weights, biases):
    x = z
    for w, b in zip(weights, biases):
        x = x @ w.T + b
        x = 0.5 * x * (1.0 + lax.erf(x * _INV_SQRT2))
    return x


if __name__ == "__main__":
    key = jax.random.PRNGKey(0)
    hidden_sizes = [32, 64, 32]      # decoder(hidden_sizes=[32, 64, 32])
    n = 1000                         # not a multiple of block_m -> exercises
                                     # the ragged-last-block path; adaptive
                                     # block_m picks 512 -> grid=(2,), so
                                     # v7x can use both TensorCores.

    key, kz = jax.random.split(key)
    z = jax.random.normal(kz, (n, 2), dtype=jnp.float32)

    weights, biases = init_decoder_params(key, hidden_sizes)

    # Default path: exact erf GELU, matches nn.GELU() semantics.
    out = decoder_forward(z, weights, biases)
    out = jax.block_until_ready(out)

    ref = decoder_reference(z, weights, biases)
    assert out.shape == (n, hidden_sizes[-1])
    assert jnp.allclose(out, ref, atol=2e-5, rtol=1e-5), "mismatch vs reference"

    # Optional fast path: tanh-approximate GELU (EUP-routed), looser tolerance.
    out_fast = decoder_forward(z, weights, biases, approximate_gelu=True)
    out_fast = jax.block_until_ready(out_fast)
    assert jnp.allclose(out_fast, ref, atol=1e-2, rtol=1e-2), "tanh GELU too far off"

    print("KERNEL_OK")
</pallas_src>

<mosaic_0001>
module attributes {stable_mosaic.version = 11 : i64} {
  func.func @kernel(%arg0: i32, %arg1: memref<2x512xf32, #tpu.memory_space<vmem>>, %arg2: memref<32x2xf32, #tpu.memory_space<vmem>>, %arg3: memref<32x1xf32, #tpu.memory_space<vmem>>, %arg4: memref<64x32xf32, #tpu.memory_space<vmem>>, %arg5: memref<64x1xf32, #tpu.memory_space<vmem>>, %arg6: memref<32x64xf32, #tpu.memory_space<vmem>>, %arg7: memref<32x1xf32, #tpu.memory_space<vmem>>, %arg8: memref<512x32xf32, #tpu.memory_space<vmem>>) attributes {dimension_semantics = [#tpu.dimension_semantics<parallel>], iteration_bounds = array<i64: 2>, scalar_prefetch = 0 : i64, scratch_operands = 0 : i64, tpu.core_type = #tpu.core_type<tc>, window_params = [{transform_indices = @transform_0, window_bounds = array<i64: 2, 512>}, {pipeline_mode = #tpu.pipeline_mode<synchronous>, transform_indices = @transform_1, window_bounds = array<i64: 32, 2>}, {pipeline_mode = #tpu.pipeline_mode<synchronous>, transform_indices = @transform_2, window_bounds = array<i64: 32, 1>}, {pipeline_mode = #tpu.pipeline_mode<synchronous>, transform_indices = @transform_3, window_bounds = array<i64: 64, 32>}, {pipeline_mode = #tpu.pipeline_mode<synchronous>, transform_indices = @transform_4, window_bounds = array<i64: 64, 1>}, {pipeline_mode = #tpu.pipeline_mode<synchronous>, transform_indices = @transform_5, window_bounds = array<i64: 32, 64>}, {pipeline_mode = #tpu.pipeline_mode<synchronous>, transform_indices = @transform_6, window_bounds = array<i64: 32, 1>}, {transform_indices = @transform_7, window_bounds = array<i64: 512, 32>}]} {
    %c0 = arith.constant 0 : index
    %c0_0 = arith.constant 0 : index
    %0 = vector.load %arg1[%c0, %c0_0] : memref<2x512xf32, #tpu.memory_space<vmem>>, vector<2x512xf32>
    %c0_1 = arith.constant 0 : index
    %c0_2 = arith.constant 0 : index
    %1 = vector.load %arg2[%c0_1, %c0_2] : memref<32x2xf32, #tpu.memory_space<vmem>>, vector<32x2xf32>
    %c0_3 = arith.constant 0 : index
    %c0_4 = arith.constant 0 : index
    %2 = vector.load %arg3[%c0_3, %c0_4] : memref<32x1xf32, #tpu.memory_space<vmem>>, vector<32x1xf32>
    %cst = arith.constant dense<0.000000e+00> : vector<32x512xf32>
    %3 = tpu.matmul %1, %0, %cst {dimension_numbers = #tpu.dot_dimension_numbers<[1], [0], [0], [1], [0, 0, 1, 1], [], []>} : vector<32x2xf32>, vector<2x512xf32>, vector<32x512xf32> -> vector<32x512xf32>
    %4 = vector.broadcast %2 : vector<32x1xf32> to vector<32x512xf32>
    %5 = arith.addf %3, %4 : vector<32x512xf32>
    %cst_5 = arith.constant 5.000000e-01 : f32
    %6 = vector.broadcast %cst_5 : f32 to vector<32x512xf32>
    %7 = arith.mulf %6, %5 : vector<32x512xf32>
    %cst_6 = arith.constant 0.707106769 : f32
    %8 = vector.broadcast %cst_6 : f32 to vector<32x512xf32>
    %9 = arith.mulf %5, %8 : vector<32x512xf32>
    %10 = math.erf %9 : vector<32x512xf32>
    %cst_7 = arith.constant 1.000000e+00 : f32
    %11 = vector.broadcast %cst_7 : f32 to vector<32x512xf32>
    %12 = arith.addf %11, %10 : vector<32x512xf32>
    %13 = arith.mulf %7, %12 : vector<32x512xf32>
    %c0_8 = arith.constant 0 : index
    %c0_9 = arith.constant 0 : index
    %14 = vector.load %arg4[%c0_8, %c0_9] : memref<64x32xf32, #tpu.memory_space<vmem>>, vector<64x32xf32>
    %c0_10 = arith.constant 0 : index
    %c0_11 = arith.constant 0 : index
    %15 = vector.load %arg5[%c0_10, %c0_11] : memref<64x1xf32, #tpu.memory_space<vmem>>, vector<64x1xf32>
    %cst_12 = arith.constant dense<0.000000e+00> : vector<64x512xf32>
    %16 = tpu.matmul %14, %13, %cst_12 {dimension_numbers = #tpu.dot_dimension_numbers<[1], [0], [0], [1], [0, 0, 1, 1], [], []>} : vector<64x32xf32>, vector<32x512xf32>, vector<64x512xf32> -> vector<64x512xf32>
    %17 = vector.broadcast %15 : vector<64x1xf32> to vector<64x512xf32>
    %18 = arith.addf %16, %17 : vector<64x512xf32>
    %cst_13 = arith.constant 5.000000e-01 : f32
    %19 = vector.broadcast %cst_13 : f32 to vector<64x512xf32>
    %20 = arith.mulf %19, %18 : vector<64x512xf32>
    %cst_14 = arith.constant 0.707106769 : f32
    %21 = vector.broadcast %cst_14 : f32 to vector<64x512xf32>
    %22 = arith.mulf %18, %21 : vector<64x512xf32>
    %23 = math.erf %22 : vector<64x512xf32>
    %cst_15 = arith.constant 1.000000e+00 : f32
    %24 = vector.broadcast %cst_15 : f32 to vector<64x512xf32>
    %25 = arith.addf %24, %23 : vector<64x512xf32>
    %26 = arith.mulf %20, %25 : vector<64x512xf32>
    %c0_16 = arith.constant 0 : index
    %c0_17 = arith.constant 0 : index
    %27 = vector.load %arg6[%c0_16, %c0_17] : memref<32x64xf32, #tpu.memory_space<vmem>>, vector<32x64xf32>
    %c0_18 = arith.constant 0 : index
    %c0_19 = arith.constant 0 : index
    %28 = vector.load %arg7[%c0_18, %c0_19] : memref<32x1xf32, #tpu.memory_space<vmem>>, vector<32x1xf32>
    %cst_20 = arith.constant dense<0.000000e+00> : vector<32x512xf32>
    %29 = tpu.matmul %27, %26, %cst_20 {dimension_numbers = #tpu.dot_dimension_numbers<[1], [0], [0], [1], [0, 0, 1, 1], [], []>} : vector<32x64xf32>, vector<64x512xf32>, vector<32x512xf32> -> vector<32x512xf32>
    %30 = vector.broadcast %28 : vector<32x1xf32> to vector<32x512xf32>
    %31 = arith.addf %29, %30 : vector<32x512xf32>
    %cst_21 = arith.constant 5.000000e-01 : f32
    %32 = vector.broadcast %cst_21 : f32 to vector<32x512xf32>
    %33 = arith.mulf %32, %31 : vector<32x512xf32>
    %cst_22 = arith.constant 0.707106769 : f32
    %34 = vector.broadcast %cst_22 : f32 to vector<32x512xf32>
    %35 = arith.mulf %31, %34 : vector<32x512xf32>
    %36 = math.erf %35 : vector<32x512xf32>
    %cst_23 = arith.constant 1.000000e+00 : f32
    %37 = vector.broadcast %cst_23 : f32 to vector<32x512xf32>
    %38 = arith.addf %37, %36 : vector<32x512xf32>
    %39 = arith.mulf %33, %38 : vector<32x512xf32>
    %40 = tpu.transpose %39, [1, 0] : vector<32x512xf32> -> vector<512x32xf32>
    %c0_24 = arith.constant 0 : index
    %c0_25 = arith.constant 0 : index
    %41 = vector.load %arg8[%c0_24, %c0_25] : memref<512x32xf32, #tpu.memory_space<vmem>>, vector<512x32xf32>
    tpu.vector_store %arg8[%c0_24, %c0_25], %40 {strides = array<i32>} : memref<512x32xf32, #tpu.memory_space<vmem>>, vector<512x32xf32>,
    return
  }
  func.func @transform_0(%arg0: i32) -> (i32, i32) {
    %c0_i32 = arith.constant 0 : i32
    %c0_i32_0 = arith.constant 0 : i32
    return %c0_i32, %arg0 : i32, i32
  }
  func.func @transform_1(%arg0: i32) -> (i32, i32) {
    %c0_i32 = arith.constant 0 : i32
    %c0_i32_0 = arith.constant 0 : i32
    %c0_i32_1 = arith.constant 0 : i32
    return %c0_i32, %c0_i32_0 : i32, i32
  }
  func.func @transform_2(%arg0: i32) -> (i32, i32) {
    %c0_i32 = arith.constant 0 : i32
    %c0_i32_0 = arith.constant 0 : i32
    %c0_i32_1 = arith.constant 0 : i32
    return %c0_i32, %c0_i32_0 : i32, i32
  }
  func.func @transform_3(%arg0: i32) -> (i32, i32) {
    %c0_i32 = arith.constant 0 : i32
    %c0_i32_0 = arith.constant 0 : i32
    %c0_i32_1 = arith.constant 0 : i32
    return %c0_i32, %c0_i32_0 : i32, i32
  }
  func.func @transform_4(%arg0: i32) -> (i32, i32) {
    %c0_i32 = arith.constant 0 : i32
    %c0_i32_0 = arith.constant 0 : i32
    %c0_i32_1 = arith.constant 0 : i32
    return %c0_i32, %c0_i32_0 : i32, i32
  }
  func.func @transform_5(%arg0: i32) -> (i32, i32) {
    %c0_i32 = arith.constant 0 : i32
    %c0_i32_0 = arith.constant 0 : i32
    %c0_i32_1 = arith.constant 0 : i32
    return %c0_i32, %c0_i32_0 : i32, i32
  }
  func.func @transform_6(%arg0: i32) -> (i32, i32) {
    %c0_i32 = arith.constant 0 : i32
    %c0_i32_0 = arith.constant 0 : i32
    %c0_i32_1 = arith.constant 0 : i32
    return %c0_i32, %c0_i32_0 : i32, i32
  }
  func.func @transform_7(%arg0: i32) -> (i32, i32) {
    %c0_i32 = arith.constant 0 : i32
    %c0_i32_0 = arith.constant 0 : i32
    return %arg0, %c0_i32 : i32, i32
  }
}

</mosaic_0001>

<bundles_post_ra>
// kernel: tpu_custom_call.1
= control target key start
LH: loop header
LB: loop body
LE: loop exit
PB: predicated region body
PF: predicated region fallthrough
CT: control target
= control target key end

     0   :  { %s2496_s24 = smov 0   ;;  %s2498_s25 = smov 0   ;;  %s3267_s0 = inlined_call_operand.vmem [shape: f32[2,1000], index: 0, kind: input, shape index: {}]   ;;  %s3268_s1 = inlined_call_operand.vmem [shape: f32[32,2], index: 1, kind: input, shape index: {}]   ;;  %s3269_s2 = inlined_call_operand.vmem [shape: f32[32,1], index: 2, kind: input, shape index: {}]   ;;  %s3270_s3 = inlined_call_operand.vmem [shape: f32[64,32], index: 3, kind: input, shape index: {}]   ;;  %s3271_s4 = inlined_call_operand.vmem [shape: f32[64,1], index: 4, kind: input, shape index: {}]   ;;  %s3272_s5 = inlined_call_operand.vmem [shape: f32[32,64], index: 5, kind: input, shape index: {}]   ;;  %s3273_s6 = inlined_call_operand.vmem [shape: f32[32,1], index: 6, kind: input, shape index: {}]   ;;  %s3274_s7 = inlined_call_operand.vmem [shape: f32[1000,32], index: 7, kind: output, shape index: {}]  }
   0x1   :  { %s2500_s26 = smov 0  }
   0x2 LB: > { %s2509_s27 = sadd.s32 4294967295, %s2419_s26   ;;  %s2511_s28 = sadd.s32 1, %s2419_s26   ;;  %s2419_s26 = sphi %s2500_s26, %s3283_s26   ;;  %s2415_s25 = sphi %s2498_s25, %s3282_s25   ;;  %s2411_s24 = sphi %s2496_s24, %s3281_s24  }
   0x3   : > { %s173_s29 = ssub.s32 %s2419_s26, %s2511_s28  ;;  %s176_s30 = sadd.s32 1, %s2415_s25 }
   0x4   : > { %p174_p0 = scmp.eq.s32.totalorder %s173_s29, 0  ;;  %p186_p1 = scmp.ne.s32.totalorder %s2415_s25, %s2411_s24 }
   0x5   : > { %p187_p2 = scmp.eq.s32.totalorder %s2509_s27, 1  ;;  %p2035_p3 = scmp.ge.s32.totalorder %s2419_s26, 1 }
   0x6   : > { %s2519_s8 = scalar_select %p174_p0, %s2415_s25, %s176_s30  }
   0x7   : > { %p2521_p4 = por %p187_p2, %p186_p1  ;;  %p238_p5 = scmp.lt.s32.totalorder %s2419_s26, 3 }
   0x9   : > { %p239_p6 = pnand %p2035_p3, %p238_p5 }
   0xa   : > { %s2037_s10 = sshll.u32 (!%p239_p6), %s2509_s27, 2  ;;  %v314_v0 = vlaneseq (!%p239_p6)  ;;  %v2453_v1 = vmov (!%p239_p6), 1983009808   ;;  %v2454_v3 = vmov (!%p239_p6), 0.0   ;;  %v2455_v5 = vmov (!%p239_p6), 0   ;;  %v285_v6 = vld [vmem:[%s3269_s2] sm:$0xff] (!%p239_p6) }
   0xb   : > { %242 = sbr.rel (%p239_p6) target bundleno = 1111 (0x457), region = 48  ;;  %p270_p7 = scmp.lt.s32.totalorder (!%p239_p6), %s2037_s10, 7  ;;  %v312_v2 = vunpack.c.l.s4 (!%p239_p6), %v2453_v1  ;;  %413 = vmatprep.mubr.f32.mxu0 (!%p239_p6), %v2454_v3  ;;  %502 = vmatprep.mubr.f32.mxu1 (!%p239_p6), %v2454_v3  ;;  %v287_v7 = vld [vmem:[%s3269_s2 + $0x10] sm:$0xff] (!%p239_p6)  ;;  %v286_v9 = vld [vmem:[%s3269_s2 + $0x8] sm:$0xff] (!%p239_p6)  ;;  %v288_v10 = vld [vmem:[%s3269_s2 + $0x18] sm:$0xff] (!%p239_p6)  ;;  %vm340_vm0 = vcmask (!%p239_p6), 1041408  }
   0xc   : > { %v315_v4 = vshrl.u32 (!%p239_p6), %v314_v0, 7  ;;  %2234 = vset.pattern.permute.xlu0 (!%p239_p6), %v2455_v5  ;;  %2235 = vset.pattern.permute.xlu1 (!%p239_p6), %v2455_v5  ;;  %v615_v15 = vld [vmem:[%s3271_s4] sm:$0xff] (!%p239_p6)  ;;  %v616_v16 = vld [vmem:[%s3271_s4 + $0x8] sm:$0xff] (!%p239_p6)  ;;  %vm327_vm1 = vcmask (!%p239_p6), 15360   ;;  %v617_v21 = vld [vmem:[%s3271_s4 + $0x10] sm:$0xff] (!%p239_p6)  ;;  %vm663_vm2 = vcmask (!%p239_p6), 261120  }
   0xd   : > { %v313_v8 = vunpack.c.0.s8 (!%p239_p6), %v312_v2  ;;  %291 = vperm.xlu0 (!%p239_p6), %2234, %v285_v6   ;;  %301 = vperm.xlu1 (!%p239_p6), %2235, %v287_v7   ;;  %v281_v19 = vld [vmem:[%s3268_s1] sm:$0xff] (!%p239_p6)  ;;  %v618_v22 = vld [vmem:[%s3271_s4 + $0x18] sm:$0xff] (!%p239_p6)  ;;  %v282_v23 = vld [vmem:[%s3268_s1 + $0x8] sm:$0xff] (!%p239_p6)  ;;  %vm1102_vm3 = vcmask (!%p239_p6), 523264   ;;  %s266_s11 = sand.u32 (!%p239_p6), 1, %s2411_s24  }
   0xe   : > { %v619_v24 = vld [vmem:[%s3271_s4 + $0x20] sm:$0xff] (!%p239_p6)  ;;  %v620_v25 = vld [vmem:[%s3271_s4 + $0x28] sm:$0xff] (!%p239_p6)  ;;  %v283_v26 = vld [vmem:[%s3268_s1 + $0x10] sm:$0xff] (!%p239_p6)  ;;  %s2036_s12 = sshll.u32 (!%p239_p6), %s266_s11, 9 }
   0xf   : > { %v316_v11 = vsub.s32 (!%p239_p6), %v313_v8, %v315_v4  ;;  %v621_v27 = vld [vmem:[%s3271_s4 + $0x30] sm:$0xff] (!%p239_p6)  ;;  %v622_v28 = vld [vmem:[%s3271_s4 + $0x38] sm:$0xff] (!%p239_p6)  ;;  %v1078_v30 = vld [vmem:[%s3273_s6] sm:$0xff] (!%p239_p6)  ;;  %s2931_s13 = scalar_lea.vmem (!%p239_p6), [#allocation2], %s2036_s12  }
  0x10   : > { %v284_v29 = vld [vmem:[%s3268_s1 + $0x18] sm:$0xff] (!%p239_p6)  ;;  %v1079_v31 = vld [vmem:[%s3273_s6 + $0x8] sm:$0xff] (!%p239_p6)  ;;  %v1080_v32 = vld [vmem:[%s3273_s6 + $0x10] sm:$0xff] (!%p239_p6) }
  0x11   : > { %296 = vperm.xlu0 (!%p239_p6), %2234, %v286_v9   ;;  %306 = vperm.xlu1 (!%p239_p6), %2235, %v288_v10   ;;  %v1081_v33 = vld [vmem:[%s3273_s6 + $0x18] sm:$0xff] (!%p239_p6) }
  0x12   : > { %s3285_s10 = smov (!%p270_p7, %s2037_s10), 7  ;;  %s2076_s24 = sshll.u32 (%p2521_p4), %s2509_s27, 6 }
  0x13   : > { %s2038_s19 = sshll.u32 %s3285_s10, 1  ;;  %s2092_s14 = sshll.u32 (%p2521_p4), %s2509_s27, 9 }
  0x14   : > { %s273_s22 = scalar_lea.vmem %s3267_s0, %s2038_s19  ;;  %s1573_s15 = ssub.s32 (%p2521_p4), 125, %s2076_s24 }
  0x15   : > { %v280_v12 = vld [vmem:[%s273_s22] sm:$0xff]  ;;  %625 = vperm.xlu0 %2234, %v615_v15   ;;  %630 = vperm.xlu1 %2235, %v616_v16   ;;  %s3068_s18 = scalar_lea.vmem (%p2521_p4), %s3274_s7, %s2092_s14   ;;  %p1574_p8 = scmp.lt.s32.totalorder (%p2521_p4), %s1573_s15, 64 }
  0x16   : > { %v317_v13 = vrot.slane %v280_v12, %v316_v11  ;;  %v310_v14 = vcombine.high %v280_v12, %v280_v12 }
  0x18   : > { %v325_v17 = vcombine.high %v317_v13, %v317_v13  ;;  %v324_v18 = vrot.slane %v310_v14, %v316_v11 }
  0x19   : > { %635 = vperm.xlu0 %2234, %v617_v21   ;;  %640 = vperm.xlu1 %2235, %v618_v22  }
  0x1a   : > { %2039 = vmatprep.subr.msk.mxu0 %vm340_vm0, %v325_v17  ;;  %v326_v20 = vcombine.high %v324_v18, %v324_v18 }
  0x1b   : > { %2040 = vmatpush1.msk.msra.mxu0 %vm340_vm0, %v317_v13 }
  0x1c   : > { %2041 = vmatmul.mubr.msk.f32.vlgmr.msra.gmra.mrb[0].mxu0 %vm327_vm1, %v281_v19  ;;  %2045 = vmatprep.subr.msk.mxu1 %vm340_vm0, %v326_v20 }
  0x1d   : > { %2046 = vmatpush1.msk.msra.mxu1 %vm340_vm0, %v324_v18  ;;  %419 = vmatprep.mubr.f32.mxu0 %v2454_v3 }
  0x1e   : > { %2047 = vmatmul.mubr.msk.f32.vlgmr.msra.gmra.mrb[0].mxu1 %vm327_vm1, %v281_v19  ;;  %645 = vperm.xlu0 %2234, %v619_v24  }
  0x1f   : > { %508 = vmatprep.mubr.f32.mxu1 %v2454_v3  ;;  %650 = vperm.xlu1 %2235, %v620_v25  }
  0x20   : > { %2042 = vmatmul.mubr.msk.f32.gmra.mrb[2].mxu0 %vm327_vm1, %v282_v23 }
  0x21   : > { %425 = vmatprep.mubr.f32.mxu0 %v2454_v3 }
  0x22   : > { %2048 = vmatmul.mubr.msk.f32.gmra.mrb[2].mxu1 %vm327_vm1, %v282_v23  ;;  %655 = vperm.xlu0 %2234, %v621_v27  }
  0x23   : > { %514 = vmatprep.mubr.f32.mxu1 %v2454_v3  ;;  %660 = vperm.xlu1 %2235, %v622_v28  }
  0x24   : > { %2043 = vmatmul.mubr.msk.f32.gmra.mrb[4].mxu0 %vm327_vm1, %v283_v26 }
  0x25   : > { %431 = vmatprep.mubr.f32.mxu0 %v2454_v3 }
  0x26   : > { %2049 = vmatmul.mubr.msk.f32.gmra.mrb[4].mxu1 %vm327_vm1, %v283_v26  ;;  %1084 = vperm.xlu0 %2234, %v1078_v30  }
  0x27   : > { %520 = vmatprep.mubr.f32.mxu1 %v2454_v3  ;;  %1089 = vperm.xlu1 %2235, %v1079_v31  }
  0x28   : > { %2044 = vmatmul.mubr.msk.f32.gmra.mrb[6].mxu0 %vm327_vm1, %v284_v29 }
  0x29   : > { %752 = vmatprep.mubr.f32.mxu0 %v2454_v3 }
  0x2a   : > { %2050 = vmatmul.mubr.msk.f32.gmra.mrb[6].mxu1 %vm327_vm1, %v284_v29  ;;  %1094 = vperm.xlu0 %2234, %v1080_v32  }
  0x2b   : > { %865 = vmatprep.mubr.f32.mxu1 %v2454_v3  ;;  %1099 = vperm.xlu1 %2235, %v1081_v33  }
  0x8c   : > { %v292_v34 = vpop.permute.xlu0 %291  ;;  %v302_v50 = vpop.permute.xlu1 %301 }
  0x90   : > { %v297_v43 = vpop.permute.xlu0 %296  ;;  %v307_v6 = vpop.permute.xlu1 %306 }
  0xef   : > { %v415_v35 = vpop.f32.mrb[0].mxu0 }
  0xf0   : > { %v416_v36 = vadd.f32 %v415_v35, %v292_v34  ;;  %v417_v37 = vpop.f32.mrb[1].mxu0 }
  0xf1   : > { %v2607_v38 = vadd.f32 %v417_v37, %v292_v34  ;;  %v504_v39 = vpop.f32.mrb[0].mxu1 }
  0xf2   : > { %v543_v40 = vmul.f32 0.70710677, %v416_v36  ;;  %v2609_v41 = vadd.f32 %v504_v39, %v292_v34  ;;  %v506_v42 = vpop.f32.mrb[1].mxu1  ;;  %v527_v23 = vmul.f32 0.5, %v416_v36 }
  0xf3   : > { %v544_v44 = vmul.f32 0.70710677, %v2607_v38  ;;  %v2612_v45 = vadd.f32 %v506_v42, %v292_v34  ;;  %v421_v46 = vpop.f32.mrb[2].mxu0  ;;  %v528_v27 = vmul.f32 0.5, %v2607_v38 }
  0xf4   : > { %2237 = verf.f32 %v543_v40  ;;  %v545_v47 = vmul.f32 0.70710677, %v2609_v41  ;;  %v2615_v48 = vadd.f32 %v421_v46, %v297_v43  ;;  %v423_v49 = vpop.f32.mrb[3].mxu0  ;;  %v529_v31 = vmul.f32 0.5, %v2609_v41 }
  0xf5   : > { %2239 = verf.f32 %v544_v44  ;;  %v546_v51 = vmul.f32 0.70710677, %v2612_v45  ;;  %v2618_v52 = vadd.f32 %v423_v49, %v297_v43  ;;  %v510_v53 = vpop.f32.mrb[2].mxu1  ;;  %v530_v32 = vmul.f32 0.5, %v2612_v45 }
  0xf6   : > { %2241 = verf.f32 %v545_v47  ;;  %v547_v54 = vmul.f32 0.70710677, %v2615_v48  ;;  %v511_v55 = vadd.f32 %v510_v53, %v297_v43  ;;  %v512_v56 = vpop.f32.mrb[3].mxu1  ;;  %v531_v35 = vmul.f32 0.5, %v2615_v48 }
  0xf7   : > { %2243 = verf.f32 %v546_v51  ;;  %v548_v57 = vmul.f32 0.70710677, %v2618_v52  ;;  %v2622_v58 = vadd.f32 %v512_v56, %v297_v43  ;;  %v427_v59 = vpop.f32.mrb[4].mxu0  ;;  %v532_v38 = vmul.f32 0.5, %v2618_v52 }
  0xf8   : > { %2245 = verf.f32 %v547_v54  ;;  %v549_v60 = vmul.f32 0.70710677, %v511_v55  ;;  %v2624_v61 = vadd.f32 %v427_v59, %v302_v50  ;;  %v429_v62 = vpop.f32.mrb[5].mxu0  ;;  %v533_v43 = vmul.f32 0.5, %v511_v55 }
  0xf9   : > { %2247 = verf.f32 %v548_v57  ;;  %v550_v63 = vmul.f32 0.70710677, %v2622_v58  ;;  %v2627_v0 = vadd.f32 %v429_v62, %v302_v50  ;;  %v516_v1 = vpop.f32.mrb[4].mxu1  ;;  %v534_v51 = vmul.f32 0.5, %v2622_v58 }
  0xfa   : > { %2249 = verf.f32 %v549_v60  ;;  %v551_v2 = vmul.f32 0.70710677, %v2624_v61  ;;  %v2630_v4 = vadd.f32 %v516_v1, %v302_v50  ;;  %v518_v5 = vpop.f32.mrb[5].mxu1 }
  0xfb   : > { %2251 = verf.f32 %v550_v63  ;;  %v552_v7 = vmul.f32 0.70710677, %v2627_v0  ;;  %v2633_v8 = vadd.f32 %v518_v5, %v302_v50  ;;  %v433_v9 = vpop.f32.mrb[6].mxu0 }
  0xfc   : > { %2253 = verf.f32 %v551_v2  ;;  %v553_v10 = vmul.f32 0.70710677, %v2630_v4  ;;  %v2636_v11 = vadd.f32 %v433_v9, %v307_v6  ;;  %v435_v12 = vpop.f32.mrb[7].mxu0  ;;  %v535_v9 = vmul.f32 0.5, %v2624_v61 }
  0xfd   : > { %2255 = verf.f32 %v552_v7  ;;  %v554_v13 = vmul.f32 0.70710677, %v2633_v8  ;;  %v2639_v14 = vadd.f32 %v435_v12, %v307_v6  ;;  %v522_v15 = vpop.f32.mrb[6].mxu1 }
  0xfe   : > { %v2238_v16 = vpop.eup %2237  ;;  %2257 = verf.f32 %v553_v10  ;;  %v555_v17 = vmul.f32 0.70710677, %v2636_v11  ;;  %v2642_v18 = vadd.f32 %v522_v15, %v307_v6  ;;  %v524_v19 = vpop.f32.mrb[7].mxu1  ;;  %v539_v10 = vmul.f32 0.5, %v2636_v11 }
  0xff   : > { %v2240_v20 = vpop.eup %2239  ;;  %2259 = verf.f32 %v554_v13  ;;  %v556_v21 = vmul.f32 0.70710677, %v2639_v14  ;;  %v575_v26 = vadd.f32 1.0, %v2238_v16  ;;  %v2647_v28 = vadd.f32 %v524_v19, %v307_v6 }
 0x100   : > { %v2242_v22 = vpop.eup %2241  ;;  %2261 = verf.f32 %v555_v17  ;;  %v557_v24 = vmul.f32 0.70710677, %v2642_v18  ;;  %v576_v30 = vadd.f32 1.0, %v2240_v20  ;;  %v536_v15 = vmul.f32 0.5, %v2627_v0 }
 0x101   : > { %v2244_v25 = vpop.eup %2243  ;;  %2263 = verf.f32 %v556_v21  ;;  %v577_v34 = vadd.f32 1.0, %v2242_v22  ;;  %v558_v37 = vmul.f32 0.70710677, %v2647_v28  ;;  %v591_v46 = vmul.f32 %v575_v26, %v527_v23 }
 0x102   : > { %v2246_v29 = vpop.eup %2245  ;;  %2265 = verf.f32 %v557_v24  ;;  %v578_v40 = vadd.f32 1.0, %v2244_v25  ;;  %v592_v49 = vmul.f32 %v576_v30, %v528_v27  ;;  %v537_v16 = vmul.f32 0.5, %v2630_v4 }
 0x103   : > { %v2248_v33 = vpop.eup %2247  ;;  %v579_v36 = vadd.f32 1.0, %v2246_v29  ;;  %2267 = verf.f32 %v558_v37  ;;  %v593_v54 = vmul.f32 %v577_v34, %v529_v31  ;;  %v540_v17 = vmul.f32 0.5, %v2639_v14  ;;  %v612_v37 = vld [vmem:[%s3270_s3 + $0x28] sm:$0xff] }
 0x104   : > { %v2250_v39 = vpop.eup %2249  ;;  %v580_v42 = vadd.f32 1.0, %v2248_v33  ;;  %v594_v60 = vmul.f32 %v578_v40, %v530_v32  ;;  %v541_v22 = vmul.f32 0.5, %v2642_v18  ;;  %v538_v0 = vmul.f32 0.5, %v2633_v8  ;;  %v607_v18 = vld [vmem:[%s3270_s3] sm:$0xff]  ;;  %v608_v8 = vld [vmem:[%s3270_s3 + $0x8] sm:$0xff]  ;;  %v614_v40 = vld [vmem:[%s3270_s3 + $0x38] sm:$0xff] }
 0x105   : > { %v2252_v44 = vpop.eup %2251  ;;  %v595_v47 = vmul.f32 %v579_v36, %v531_v35  ;;  %v581_v41 = vadd.f32 1.0, %v2250_v39  ;;  %v542_v4 = vmul.f32 0.5, %v2647_v28  ;;  %v609_v28 = vld [vmem:[%s3270_s3 + $0x10] sm:$0xff]  ;;  %v610_v35 = vld [vmem:[%s3270_s3 + $0x18] sm:$0xff]  ;;  %v611_v36 = vld [vmem:[%s3270_s3 + $0x20] sm:$0xff] }
 0x106   : > { %v2254_v45 = vpop.eup %2253  ;;  %v596_v50 = vmul.f32 %v580_v42, %v532_v38  ;;  %v582_v48 = vadd.f32 1.0, %v2252_v44  ;;  %v613_v39 = vld [vmem:[%s3270_s3 + $0x30] sm:$0xff]  ;;  %v626_v38 = vpop.permute.xlu0 %625 }
 0x107   : > { %v2256_v53 = vpop.eup %2255  ;;  %v2097_v56 = vpack.c.bf16 %v595_v47, %v591_v46  ;;  %v597_v57 = vmul.f32 %v581_v41, %v533_v43  ;;  %v583_v1 = vadd.f32 1.0, %v2254_v45  ;;  %v631_v47 = vpop.permute.xlu1 %630 }
 0x108   : > { %v2258_v59 = vpop.eup %2257  ;;  %v598_v52 = vmul.f32 %v582_v48, %v534_v51  ;;  %v2095_v62 = vpack.c.bf16 %v596_v50, %v592_v49  ;;  %v584_v5 = vadd.f32 1.0, %v2256_v53 }
 0x109   : > { %v2260_v55 = vpop.eup %2259  ;;  %v2105_v63 = vpack.c.bf16 %v597_v57, %v593_v54  ;;  %v585_v58 = vadd.f32 1.0, %v2258_v59  ;;  %v599_v20 = vmul.f32 %v583_v1, %v535_v9 }
 0x10a   : > { %v2262_v2 = vpop.eup %2261  ;;  %2096 = vmatprep.subr.bf16.mxu0 %v2095_v62  ;;  %v2103_v6 = vpack.c.bf16 %v598_v52, %v594_v60  ;;  %v600_v61 = vmul.f32 %v584_v5, %v536_v15  ;;  %v586_v24 = vadd.f32 1.0, %v2260_v55  ;;  %v636_v52 = vpop.permute.xlu0 %635 }
 0x10b   : > { %v2264_v7 = vpop.eup %2263  ;;  %v587_v12 = vadd.f32 1.0, %v2262_v2  ;;  %2098 = vmatpush1.bf16.msra.mxu0 %v2097_v56  ;;  %v601_v26 = vmul.f32 %v585_v58, %v537_v16  ;;  %v641_v15 = vpop.permute.xlu1 %640 }
 0x10c   : > { %v2266_v13 = vpop.eup %2265  ;;  %v588_v19 = vadd.f32 1.0, %v2264_v7  ;;  %2104 = vmatprep.subr.bf16.mxu1 %v2103_v6  ;;  %v602_v32 = vmul.f32 %v586_v24, %v538_v0 }
 0x10d   : > { %v603_v21 = vmul.f32 %v587_v12, %v539_v10  ;;  %v589_v23 = vadd.f32 1.0, %v2266_v13  ;;  %2106 = vmatpush1.bf16.msra.mxu1 %v2105_v63  ;;  %v2268_v25 = vpop.eup %2267 }
 0x10e   : > { %v604_v11 = vmul.f32 %v588_v19, %v540_v17  ;;  %v590_v14 = vadd.f32 1.0, %v2268_v25 }
 0x10f   : > { %v2101_v27 = vpack.c.bf16 %v603_v21, %v599_v20  ;;  %v605_v29 = vmul.f32 %v589_v23, %v541_v22 }
 0x110   : > { %v2099_v30 = vpack.c.bf16 %v604_v11, %v600_v61  ;;  %v606_v33 = vmul.f32 %v590_v14, %v542_v4 }
 0x111   : > { %v2109_v31 = vpack.c.bf16 %v605_v29, %v601_v26 }
 0x112   : > { %2100 = vmatprep.subr.bf16.mxu0 %v2099_v30  ;;  %v2107_v34 = vpack.c.bf16 %v606_v33, %v602_v32 }
 0x113   : > { %2102 = vmatpush1.bf16.msra.mxu0 %v2101_v27 }
 0x114   : > { %2108 = vmatprep.subr.bf16.mxu1 %v2107_v34 }
 0x115   : > { %2110 = vmatpush1.bf16.msra.mxu1 %v2109_v31 }
 0x116   : > { %2051 = vmatmul.mubr.msk.f32.vlgmr.msra.gmra.mrb[8].mxu0 %vm663_vm2, %v607_v18 }
 0x117   : > { %758 = vmatprep.mubr.f32.mxu0 %v2454_v3 }
 0x118   : > { %2059 = vmatmul.mubr.msk.f32.vlgmr.msra.gmra.mrb[8].mxu1 %vm663_vm2, %v607_v18 }
 0x119   : > { %871 = vmatprep.mubr.f32.mxu1 %v2454_v3 }
 0x11a   : > { %2052 = vmatmul.mubr.msk.f32.gmra.mrb[10].mxu0 %vm663_vm2, %v608_v8 }
 0x11b   : > { %764 = vmatprep.mubr.f32.mxu0 %v2454_v3 }
 0x11c   : > { %2060 = vmatmul.mubr.msk.f32.gmra.mrb[10].mxu1 %vm663_vm2, %v608_v8 }
 0x11d   : > { %877 = vmatprep.mubr.f32.mxu1 %v2454_v3 }
 0x11e   : > { %2053 = vmatmul.mubr.msk.f32.gmra.mrb[12].mxu0 %vm663_vm2, %v609_v28 }
 0x11f   : > { %770 = vmatprep.mubr.f32.mxu0 %v2454_v3 }
 0x120   : > { %2061 = vmatmul.mubr.msk.f32.gmra.mrb[12].mxu1 %vm663_vm2, %v609_v28 }
 0x121   : > { %883 = vmatprep.mubr.f32.mxu1 %v2454_v3 }
 0x122   : > { %2054 = vmatmul.mubr.msk.f32.gmra.mrb[14].mxu0 %vm663_vm2, %v610_v35 }
 0x123   : > { %776 = vmatprep.mubr.f32.mxu0 %v2454_v3 }
 0x124   : > { %2062 = vmatmul.mubr.msk.f32.gmra.mrb[14].mxu1 %vm663_vm2, %v610_v35 }
 0x125   : > { %889 = vmatprep.mubr.f32.mxu1 %v2454_v3 }
 0x126   : > { %2055 = vmatmul.mubr.msk.f32.gmra.mrb[16].mxu0 %vm663_vm2, %v611_v36 }
 0x127   : > { %782 = vmatprep.mubr.f32.mxu0 %v2454_v3 }
 0x128   : > { %2063 = vmatmul.mubr.msk.f32.gmra.mrb[16].mxu1 %vm663_vm2, %v611_v36  ;;  %v646_v36 = vpop.permute.xlu0 %645 }
 0x129   : > { %895 = vmatprep.mubr.f32.mxu1 %v2454_v3 }
 0x12a   : > { %2056 = vmatmul.mubr.msk.f32.gmra.mrb[18].mxu0 %vm663_vm2, %v612_v37 }
 0x12b   : > { %788 = vmatprep.mubr.f32.mxu0 %v2454_v3 }
 0x12c   : > { %2064 = vmatmul.mubr.msk.f32.gmra.mrb[18].mxu1 %vm663_vm2, %v612_v37 }
 0x12d   : > { %901 = vmatprep.mubr.f32.mxu1 %v2454_v3 }
 0x12e   : > { %2057 = vmatmul.mubr.msk.f32.gmra.mrb[20].mxu0 %vm663_vm2, %v613_v39 }
 0x12f   : > { %794 = vmatprep.mubr.f32.mxu0 %v2454_v3 }
 0x130   : > { %2065 = vmatmul.mubr.msk.f32.gmra.mrb[20].mxu1 %vm663_vm2, %v613_v39 }
 0x131   : > { %907 = vmatprep.mubr.f32.mxu1 %v2454_v3 }
 0x132   : > { %2058 = vmatmul.mubr.msk.f32.gmra.mrb[22].mxu0 %vm663_vm2, %v614_v40 }
 0x133   : > { %1179 = vmatprep.mubr.f32.mxu0 %v2454_v3 }
 0x134   : > { %2066 = vmatmul.mubr.msk.f32.gmra.mrb[22].mxu1 %vm663_vm2, %v614_v40 }
 0x135   : > { %1268 = vmatprep.mubr.f32.mxu1 %v2454_v3 }
 0x1e9   : > { %v754_v42 = vpop.f32.mrb[8].mxu0 }
 0x1ea   : > { %v755_v43 = vadd.f32 %v754_v42, %v626_v38  ;;  %v756_v44 = vpop.f32.mrb[9].mxu0 }
 0x1eb   : > { %v757_v46 = vadd.f32 %v756_v44, %v626_v38  ;;  %v867_v49 = vpop.f32.mrb[8].mxu1 }
 0x1ec   : > { %v946_v41 = vmul.f32 0.70710677, %v755_v43  ;;  %v868_v51 = vadd.f32 %v867_v49, %v626_v38  ;;  %v869_v48 = vpop.f32.mrb[9].mxu1  ;;  %v914_v61 = vmul.f32 0.5, %v755_v43 }
 0x1ed   : > { %v947_v45 = vmul.f32 0.70710677, %v757_v46  ;;  %v760_v50 = vpop.f32.mrb[10].mxu0  ;;  %v870_v56 = vadd.f32 %v869_v48, %v626_v38  ;;  %v2721_v25 = vmul.f32 0.5, %v757_v46 }
 0x1ee   : > { %v761_v53 = vadd.f32 %v760_v50, %v631_v47  ;;  %v762_v54 = vpop.f32.mrb[11].mxu0  ;;  %2269 = verf.f32 %v946_v41  ;;  %v948_v59 = vmul.f32 0.70710677, %v868_v51  ;;  %v916_v26 = vmul.f32 0.5, %v868_v51 }
 0x1ef   : > { %v763_v57 = vadd.f32 %v762_v54, %v631_v47  ;;  %2271 = verf.f32 %v947_v45  ;;  %v949_v62 = vmul.f32 0.70710677, %v870_v56  ;;  %v873_v63 = vpop.f32.mrb[10].mxu1  ;;  %v2723_v14 = vmul.f32 0.5, %v870_v56 }
 0x1f0   : > { %v950_v60 = vmul.f32 0.70710677, %v761_v53  ;;  %2273 = verf.f32 %v948_v59  ;;  %v874_v2 = vadd.f32 %v873_v63, %v631_v47  ;;  %v875_v5 = vpop.f32.mrb[11].mxu1  ;;  %v918_v30 = vmul.f32 0.5, %v761_v53 }
 0x1f1   : > { %v951_v55 = vmul.f32 0.70710677, %v763_v57  ;;  %v766_v1 = vpop.f32.mrb[12].mxu0  ;;  %v876_v9 = vadd.f32 %v875_v5, %v631_v47  ;;  %v2725_v31 = vmul.f32 0.5, %v763_v57 }
 0x1f2   : > { %v767_v6 = vadd.f32 %v766_v1, %v636_v52  ;;  %v768_v7 = vpop.f32.mrb[13].mxu0  ;;  %2275 = verf.f32 %v950_v60  ;;  %v952_v10 = vmul.f32 0.70710677, %v874_v2  ;;  %v920_v34 = vmul.f32 0.5, %v874_v2 }
 0x1f3   : > { %v769_v58 = vadd.f32 %v768_v7, %v636_v52  ;;  %2277 = verf.f32 %v949_v62  ;;  %v879_v12 = vpop.f32.mrb[12].mxu1  ;;  %v953_v16 = vmul.f32 0.70710677, %v876_v9  ;;  %v2727_v37 = vmul.f32 0.5, %v876_v9 }
 0x1f4   : > { %2279 = verf.f32 %v951_v55  ;;  %v954_v17 = vmul.f32 0.70710677, %v767_v6  ;;  %v880_v20 = vadd.f32 %v879_v12, %v636_v52  ;;  %v881_v21 = vpop.f32.mrb[13].mxu1  ;;  %v2729_v39 = vmul.f32 0.5, %v767_v6 }
 0x1f5   : > { %v772_v13 = vpop.f32.mrb[14].mxu0  ;;  %2281 = verf.f32 %v952_v10  ;;  %v955_v19 = vmul.f32 0.70710677, %v769_v58  ;;  %v882_v24 = vadd.f32 %v881_v21, %v636_v52  ;;  %v2732_v45 = vmul.f32 0.5, %v769_v58 }
 0x1f6   : > { %v773_v22 = vadd.f32 %v772_v13, %v641_v15  ;;  %v774_v23 = vpop.f32.mrb[15].mxu0  ;;  %2283 = verf.f32 %v954_v17  ;;  %v956_v27 = vmul.f32 0.70710677, %v880_v20  ;;  %v2734_v49 = vmul.f32 0.5, %v880_v20  ;;  %v651_v20 = vpop.permute.xlu1 %650 }
 0x1f7   : > { %v2719_v11 = vadd.f32 %v774_v23, %v641_v15  ;;  %v885_v29 = vpop.f32.mrb[14].mxu1  ;;  %2285 = verf.f32 %v953_v16  ;;  %v957_v8 = vmul.f32 0.70710677, %v882_v24  ;;  %v2738_v60 = vmul.f32 0.5, %v882_v24 }
 0x1f8   : > { %v2270_v4 = vpop.eup %2269  ;;  %v887_v32 = vpop.f32.mrb[15].mxu1  ;;  %2287 = verf.f32 %v955_v19  ;;  %v958_v28 = vmul.f32 0.70710677, %v773_v22  ;;  %v886_v42 = vadd.f32 %v885_v29, %v641_v15  ;;  %v926_v58 = vmul.f32 0.5, %v773_v22 }
 0x1f9   : > { %v778_v0 = vpop.f32.mrb[16].mxu0  ;;  %v2272_v18 = vpop.eup %2271  ;;  %2289 = verf.f32 %v956_v27  ;;  %v959_v40 = vmul.f32 0.70710677, %v2719_v11  ;;  %v1010_v38 = vadd.f32 1.0, %v2270_v4  ;;  %v888_v43 = vadd.f32 %v887_v32, %v641_v15 }
 0x1fa   : > { %v780_v33 = vpop.f32.mrb[17].mxu0  ;;  %v2274_v35 = vpop.eup %2273  ;;  %2291 = verf.f32 %v958_v28  ;;  %v1011_v41 = vadd.f32 1.0, %v2272_v18  ;;  %v779_v50 = vadd.f32 %v778_v0, %v646_v36  ;;  %v960_v57 = vmul.f32 0.70710677, %v886_v42 }
 0x1fb   : > { %v891_v44 = vpop.f32.mrb[16].mxu1  ;;  %v1012_v54 = vadd.f32 1.0, %v2274_v35  ;;  %2293 = verf.f32 %v957_v8  ;;  %v961_v52 = vmul.f32 0.70710677, %v888_v43  ;;  %v2740_v62 = vadd.f32 %v780_v33, %v646_v36 }
 0x1fc   : > { %v2276_v47 = vpop.eup %2275  ;;  %v893_v51 = vpop.f32.mrb[17].mxu1  ;;  %2295 = verf.f32 %v959_v40  ;;  %v2742_v63 = vmul.f32 %v1010_v38, %v914_v61  ;;  %v962_v2 = vmul.f32 0.70710677, %v779_v50  ;;  %v892_v61 = vadd.f32 %v891_v44, %v646_v36 }
 0x1fd   : > { %v784_v46 = vpop.f32.mrb[18].mxu0  ;;  %v2278_v53 = vpop.eup %2277  ;;  %v1014_v56 = vadd.f32 1.0, %v2276_v47  ;;  %2297 = verf.f32 %v960_v57  ;;  %v2750_v15 = vmul.f32 %v1012_v54, %v916_v26  ;;  %v963_v23 = vmul.f32 0.70710677, %v2740_v62 }
 0x1fe   : > { %v2736_v48 = vpop.f32.mrb[19].mxu0  ;;  %v2280_v59 = vpop.eup %2279  ;;  %v1013_v7 = vadd.f32 1.0, %v2278_v53  ;;  %2299 = verf.f32 %v961_v52  ;;  %v894_v22 = vadd.f32 %v893_v51, %v646_v36  ;;  %v2758_v27 = vmul.f32 %v1011_v41, %v2721_v25 }
 0x1ff   : > { %v2282_v55 = vpop.eup %2281  ;;  %v2744_v1 = vmul.f32 %v1014_v56, %v918_v30  ;;  %v897_v5 = vpop.f32.mrb[18].mxu1  ;;  %v1015_v17 = vadd.f32 1.0, %v2280_v59  ;;  %2301 = verf.f32 %v962_v2  ;;  %v2761_v26 = vmul.f32 0.5, %v2719_v11 }
 0x200   : > { %v1016_v9 = vadd.f32 1.0, %v2282_v55  ;;  %v899_v10 = vpop.f32.mrb[19].mxu1  ;;  %v2284_v13 = vpop.eup %2283  ;;  %v785_v0 = vadd.f32 %v784_v46, %v651_v20  ;;  %v2766_v33 = vmul.f32 %v1013_v7, %v2723_v14  ;;  %v2770_v8 = vmul.f32 0.5, %v888_v43 }
 0x201   : > { %v2746_v6 = vpop.f32.mrb[20].mxu0  ;;  %v2113_v16 = vpack.c.bf16 %v2744_v1, %v2742_v63  ;;  %v2286_v19 = vpop.eup %2285  ;;  %v1018_v29 = vadd.f32 1.0, %v2284_v13  ;;  %v2773_v11 = vmul.f32 %v1015_v17, %v2725_v31  ;;  %v2775_v40 = vmul.f32 0.5, %v779_v50 }
 0x202   : > { %v2748_v12 = vpop.f32.mrb[21].mxu0  ;;  %v2754_v21 = vmul.f32 %v1016_v9, %v920_v34  ;;  %v2288_v24 = vpop.eup %2287  ;;  %v928_v34 = vmul.f32 0.5, %v886_v42  ;;  %v1017_v36 = vadd.f32 1.0, %v2286_v19  ;;  %v964_v38 = vmul.f32 0.70710677, %v892_v61 }
 0x203   : > { %v903_v4 = vpop.f32.mrb[20].mxu1  ;;  %v2290_v32 = vpop.eup %2289  ;;  %v1019_v44 = vadd.f32 1.0, %v2288_v24  ;;  %2303 = verf.f32 %v963_v23  ;;  %v965_v14 = vmul.f32 0.70710677, %v894_v22  ;;  %v2778_v41 = vmul.f32 %v1018_v29, %v2729_v39 }
 0x204   : > { %v2129_v18 = vpack.c.bf16 %v2754_v21, %v2750_v15  ;;  %v905_v25 = vpop.f32.mrb[21].mxu1  ;;  %v2292_v35 = vpop.eup %2291  ;;  %v1020_v42 = vadd.f32 1.0, %v2290_v32  ;;  %2305 = verf.f32 %v964_v38  ;;  %v966_v43 = vmul.f32 0.70710677, %v785_v0 }
 0x205   : > { %v2763_v30 = vpop.f32.mrb[22].mxu0  ;;  %v1022_v46 = vadd.f32 1.0, %v2292_v35  ;;  %v2294_v47 = vpop.eup %2293  ;;  %2307 = verf.f32 %v965_v14  ;;  %v787_v50 = vadd.f32 %v2736_v48, %v651_v20  ;;  %v898_v54 = vadd.f32 %v897_v5, %v651_v20 }
 0x206   : > { %v798_v28 = vpop.f32.mrb[23].mxu0  ;;  %v2296_v53 = vpop.eup %2295  ;;  %v2788_v52 = vmul.f32 %v1017_v36, %v2727_v37  ;;  %v2791_v39 = vmul.f32 0.5, %v2740_v62  ;;  %2309 = verf.f32 %v966_v43  ;;  %v900_v55 = vadd.f32 %v899_v10, %v651_v20 }
 0x207   : > { %v2780_v51 = vpop.f32.mrb[22].mxu1  ;;  %v2782_v31 = vmul.f32 %v1022_v46, %v926_v58  ;;  %v2298_v57 = vpop.eup %2297  ;;  %v967_v58 = vmul.f32 0.70710677, %v787_v50  ;;  %v2799_v13 = vmul.f32 %v1019_v44, %v2732_v45  ;;  %v1021_v37 = vadd.f32 1.0, %v2294_v47 }
 0x208   : > { %v2785_v56 = vpop.f32.mrb[23].mxu1  ;;  %v656_v59 = vpop.permute.xlu0 %655  ;;  %v1024_v9 = vadd.f32 1.0, %v2298_v57  ;;  %v2801_v17 = vmul.f32 0.5, %v892_v61  ;;  %v968_v62 = vmul.f32 0.70710677, %v898_v54  ;;  %v2804_v19 = vmul.f32 %v1020_v42, %v2734_v49 }
 0x209   : > { %v2300_v2 = vpop.eup %2299  ;;  %v2117_v7 = vpack.c.bf16 %v2782_v31, %v2778_v41  ;;  %v2796_v48 = vadd.f32 %v2746_v6, %v656_v59  ;;  %2311 = verf.f32 %v967_v58  ;;  %v969_v20 = vmul.f32 0.70710677, %v900_v55  ;;  %v661_v32 = vpop.permute.xlu1 %660 }
 0x20a   : > { %v2302_v5 = vpop.eup %2301  ;;  %v2806_v10 = vmul.f32 %v1024_v9, %v928_v34  ;;  %v1023_v23 = vadd.f32 1.0, %v2296_v53  ;;  %v2808_v24 = vmul.f32 0.5, %v894_v22  ;;  %v934_v6 = vmul.f32 0.5, %v785_v0 }
 0x20b   : > { %2313 = verf.f32 %v968_v62  ;;  %v1025_v29 = vadd.f32 1.0, %v2300_v2  ;;  %v970_v61 = vmul.f32 0.70710677, %v2796_v48  ;;  %v1026_v35 = vadd.f32 1.0, %v2302_v5 }
 0x20c   : > { %v2133_v45 = vpack.c.bf16 %v2806_v10, %v2804_v19  ;;  %2315 = verf.f32 %v969_v20  ;;  %v2814_v49 = vadd.f32 %v2748_v12, %v656_v59  ;;  %v2816_v34 = vadd.f32 %v903_v4, %v656_v59 }
 0x20d   : > { %v2818_v36 = vadd.f32 %v905_v25, %v656_v59  ;;  %v2304_v22 = vpop.eup %2303  ;;  %v1053_v0 = vmul.f32 %v1021_v37, %v2738_v60  ;;  %v2111_v38 = vpack.c.bf16 %v2773_v11, %v2758_v27  ;;  %v2824_v44 = vadd.f32 %v2763_v30, %v661_v32 }
 0x20e   : > { %v2826_v46 = vadd.f32 %v798_v28, %v661_v32  ;;  %v2306_v14 = vpop.eup %2305  ;;  %v1055_v47 = vmul.f32 %v1023_v23, %v2761_v26  ;;  %v935_v12 = vmul.f32 0.5, %v787_v50  ;;  %v971_v4 = vmul.f32 0.70710677, %v2814_v49 }
 0x20f   : > { %v972_v25 = vmul.f32 0.70710677, %v2816_v34  ;;  %v2308_v42 = vpop.eup %2307  ;;  %v936_v43 = vmul.f32 0.5, %v898_v54  ;;  %v937_v53 = vmul.f32 0.5, %v900_v55  ;;  %2317 = verf.f32 %v970_v61  ;;  %2112 = vmatprep.subr.bf16.mxu0 %v2111_v38 }
 0x210   : > { %v973_v60 = vmul.f32 0.70710677, %v2818_v36  ;;  %v2310_v27 = vpop.eup %2309  ;;  %v1057_v30 = vmul.f32 %v1025_v29, %v2770_v8  ;;  %v1058_v28 = vmul.f32 %v1026_v35, %v2775_v40  ;;  %2319 = verf.f32 %v971_v4  ;;  %2114 = vmatpush1.bf16.msra.mxu0 %v2113_v16 }
 0x211   : > { %v974_v26 = vmul.f32 0.70710677, %v2824_v44  ;;  %v1027_v11 = vadd.f32 1.0, %v2304_v22  ;;  %v1030_v50 = vadd.f32 1.0, %v2310_v27  ;;  %2321 = verf.f32 %v972_v25 }
 0x212   : > { %v975_v54 = vmul.f32 0.70710677, %v2826_v46  ;;  %v1028_v57 = vadd.f32 1.0, %v2306_v14  ;;  %2323 = verf.f32 %v973_v60  ;;  %v2127_v59 = vpack.c.bf16 %v2788_v52, %v2766_v33 }
 0x213   : > { %v910_v8 = vadd.f32 %v2780_v51, %v661_v32  ;;  %v2312_v40 = vpop.eup %2311  ;;  %v1062_v55 = vmul.f32 %v1030_v50, %v934_v6  ;;  %2325 = verf.f32 %v974_v26  ;;  %v912_v2 = vadd.f32 %v2785_v56, %v661_v32 }
 0x214   : > { %v2115_v63 = vpack.c.bf16 %v1055_v47, %v2799_v13  ;;  %v1029_v16 = vadd.f32 1.0, %v2308_v42  ;;  %v1031_v9 = vadd.f32 1.0, %v2312_v40  ;;  %2327 = verf.f32 %v975_v54  ;;  %2128 = vmatprep.subr.bf16.mxu1 %v2127_v59  ;;  %v1076_v59 = vld [vmem:[%s3272_s5 + $0x10] sm:$0xff]  ;;  %v2888_v40 = vpop.permute.xlu0 %1084 }
 0x215   : > { %v2314_v1 = vpop.eup %2313  ;;  %v976_v58 = vmul.f32 0.70710677, %v910_v8  ;;  %v1059_v37 = vmul.f32 %v1027_v11, %v2791_v39  ;;  %v2121_v62 = vpack.c.bf16 %v1062_v55, %v1058_v28  ;;  %2130 = vmatpush1.bf16.msra.mxu1 %v2129_v18  ;;  %v977_v51 = vmul.f32 0.70710677, %v912_v2 }
 0x216   : > { %v2316_v5 = vpop.eup %2315  ;;  %v1032_v33 = vadd.f32 1.0, %v2314_v1  ;;  %2116 = vmatprep.subr.bf16.mxu0 %v2115_v63  ;;  %v1063_v56 = vmul.f32 %v1031_v9, %v935_v12  ;;  %v2131_v13 = vpack.c.bf16 %v1057_v30, %v1053_v0  ;;  %v1060_v20 = vmul.f32 %v1028_v57, %v2801_v17  ;;  %v1074_v57 = vld [vmem:[%s3272_s5] sm:$0xff] }
 0x217   : > { %v1033_v52 = vadd.f32 1.0, %v2316_v5  ;;  %2329 = verf.f32 %v976_v58  ;;  %2118 = vmatpush1.bf16.msra.mxu0 %v2117_v7  ;;  %v1061_v39 = vmul.f32 %v1029_v16, %v2808_v24  ;;  %v938_v35 = vmul.f32 0.5, %v2796_v48  ;;  %v2892_v16 = vpop.permute.xlu1 %1089 }
 0x218   : > { %v1064_v23 = vmul.f32 %v1032_v33, %v936_v43  ;;  %2331 = verf.f32 %v977_v51  ;;  %2132 = vmatprep.subr.bf16.mxu1 %v2131_v13  ;;  %v2119_v15 = vpack.c.bf16 %v1063_v56, %v1059_v37  ;;  %v942_v22 = vmul.f32 0.5, %v2824_v44  ;;  %v2900_v56 = vpop.permute.xlu0 %1094 }
 0x219   : > { %v1065_v6 = vmul.f32 %v1033_v52, %v937_v53  ;;  %v2318_v21 = vpop.eup %2317  ;;  %2134 = vmatpush1.bf16.msra.mxu1 %v2133_v45  ;;  %v939_v19 = vmul.f32 0.5, %v2814_v49  ;;  %v943_v45 = vmul.f32 0.5, %v2826_v46  ;;  %v940_v12 = vmul.f32 0.5, %v2816_v34 }
 0x21a   : > { %v2137_v18 = vpack.c.bf16 %v1064_v23, %v1060_v20  ;;  %v2320_v29 = vpop.eup %2319  ;;  %2120 = vmatprep.subr.bf16.mxu0 %v2119_v15  ;;  %v1034_v17 = vadd.f32 1.0, %v2318_v21  ;;  %v944_v60 = vmul.f32 0.5, %v910_v8  ;;  %v941_v44 = vmul.f32 0.5, %v2818_v36  ;;  %v1075_v36 = vld [vmem:[%s3272_s5 + $0x8] sm:$0xff]  ;;  %v1077_v8 = vld [vmem:[%s3272_s5 + $0x18] sm:$0xff] }
 0x21b   : > { %v2135_v41 = vpack.c.bf16 %v1065_v6, %v1061_v39  ;;  %v2322_v31 = vpop.eup %2321  ;;  %2122 = vmatpush1.bf16.msra.mxu0 %v2121_v62  ;;  %v1035_v32 = vadd.f32 1.0, %v2320_v29  ;;  %v945_v30 = vmul.f32 0.5, %v912_v2  ;;  %v2910_v29 = vpop.permute.xlu1 %1099 }
 0x21c   : > { %v2324_v7 = vpop.eup %2323  ;;  %v1036_v10 = vadd.f32 1.0, %v2322_v31  ;;  %v1066_v47 = vmul.f32 %v1034_v17, %v938_v35 }
 0x21d   : > { %2136 = vmatprep.subr.bf16.mxu1 %v2135_v41  ;;  %v2326_v61 = vpop.eup %2325  ;;  %v1037_v4 = vadd.f32 1.0, %v2324_v7  ;;  %v1067_v43 = vmul.f32 %v1035_v32, %v939_v19 }
 0x21e   : > { %2138 = vmatpush1.bf16.msra.mxu1 %v2137_v18  ;;  %v2328_v24 = vpop.eup %2327  ;;  %v1038_v0 = vadd.f32 1.0, %v2326_v61  ;;  %v1068_v28 = vmul.f32 %v1036_v10, %v940_v12 }
 0x21f   : > { %v1039_v38 = vadd.f32 1.0, %v2328_v24  ;;  %v1069_v11 = vmul.f32 %v1037_v4, %v941_v44 }
 0x220   : > { %v1070_v25 = vmul.f32 %v1038_v0, %v942_v22 }
 0x221   : > { %v2330_v14 = vpop.eup %2329  ;;  %v1071_v53 = vmul.f32 %v1039_v38, %v943_v45 }
 0x222   : > { %v2332_v42 = vpop.eup %2331  ;;  %v1040_v48 = vadd.f32 1.0, %v2330_v14  ;;  %v2125_v27 = vpack.c.bf16 %v1070_v25, %v1066_v47 }
 0x223   : > { %v1041_v49 = vadd.f32 1.0, %v2332_v42  ;;  %v2123_v46 = vpack.c.bf16 %v1071_v53, %v1067_v43 }
 0x224   : > { %v1072_v26 = vmul.f32 %v1040_v48, %v944_v60 }
 0x225   : > { %v1073_v50 = vmul.f32 %v1041_v49, %v945_v30  ;;  %2124 = vmatprep.subr.bf16.mxu0 %v2123_v46 }
 0x226   : > { %v2141_v54 = vpack.c.bf16 %v1072_v26, %v1068_v28  ;;  %2126 = vmatpush1.bf16.msra.mxu0 %v2125_v27 }
 0x227   : > { %v2139_v34 = vpack.c.bf16 %v1073_v50, %v1069_v11 }
 0x229   : > { %2140 = vmatprep.subr.bf16.mxu1 %v2139_v34  ;;  %2067 = vmatmul.mubr.msk.f32.vlgmr.msra.gmra.mrb[24].mxu0 %vm1102_vm3, %v1074_v57 }
 0x22a   : > { %2142 = vmatpush1.bf16.msra.mxu1 %v2141_v54  ;;  %1185 = vmatprep.mubr.f32.mxu0 %v2454_v3 }
 0x22d   : > { %2071 = vmatmul.mubr.msk.f32.vlgmr.msra.gmra.mrb[24].mxu1 %vm1102_vm3, %v1074_v57  ;;  %2068 = vmatmul.mubr.msk.f32.gmra.mrb[26].mxu0 %vm1102_vm3, %v1075_v36 }
 0x22e   : > { %1274 = vmatprep.mubr.f32.mxu1 %v2454_v3  ;;  %1191 = vmatprep.mubr.f32.mxu0 %v2454_v3 }
 0x231   : > { %2072 = vmatmul.mubr.msk.f32.gmra.mrb[26].mxu1 %vm1102_vm3, %v1075_v36  ;;  %2069 = vmatmul.mubr.msk.f32.gmra.mrb[28].mxu0 %vm1102_vm3, %v1076_v59 }
 0x232   : > { %1280 = vmatprep.mubr.f32.mxu1 %v2454_v3  ;;  %1197 = vmatprep.mubr.f32.mxu0 %v2454_v3 }
 0x235   : > { %2073 = vmatmul.mubr.msk.f32.gmra.mrb[28].mxu1 %vm1102_vm3, %v1076_v59  ;;  %2070 = vmatmul.mubr.msk.f32.gmra.mrb[30].mxu0 %vm1102_vm3, %v1077_v8 }
 0x236   : > { %1286 = vmatprep.mubr.f32.mxu1 %v2454_v3 }
 0x239   : > { %2074 = vmatmul.mubr.msk.f32.gmra.mrb[30].mxu1 %vm1102_vm3, %v1077_v8 }
 0x2fc   : > { %v1181_v55 = vpop.f32.mrb[24].mxu0 }
 0x2fd   : > { %v1182_v2 = vadd.f32 %v1181_v55, %v2888_v40  ;;  %v1183_v63 = vpop.f32.mrb[25].mxu0 }
 0x2fe   : > { %v1184_v1 = vadd.f32 %v1183_v63, %v2888_v40 }
 0x2ff   : > { %v1309_v9 = vmul.f32 0.70710677, %v1182_v2  ;;  %v1293_v45 = vmul.f32 0.5, %v1182_v2 }
 0x300   : > { %v2894_v58 = vpop.f32.mrb[24].mxu1  ;;  %v1310_v5 = vmul.f32 0.70710677, %v1184_v1  ;;  %v1187_v62 = vpop.f32.mrb[26].mxu0  ;;  %v1294_v12 = vmul.f32 0.5, %v1184_v1 }
 0x301   : > { %v2896_v37 = vpop.f32.mrb[25].mxu1  ;;  %2333 = verf.f32 %v1309_v9  ;;  %v1188_v3 = vadd.f32 %v1187_v62, %v2892_v16  ;;  %v1189_v33 = vpop.f32.mrb[27].mxu0  ;;  %v1271_v9 = vadd.f32 %v2894_v58, %v2888_v40 }
 0x302   : > { %2335 = verf.f32 %v1310_v5  ;;  %v1190_v51 = vadd.f32 %v1189_v33, %v2892_v16  ;;  %v1273_v5 = vadd.f32 %v2896_v37, %v2888_v40 }
 0x303   : > { %v1313_v52 = vmul.f32 0.70710677, %v1188_v3  ;;  %v1297_v43 = vmul.f32 0.5, %v1188_v3  ;;  %v1311_v62 = vmul.f32 0.70710677, %v1271_v9 }
 0x304   : > { %v1314_v13 = vmul.f32 0.70710677, %v1190_v51  ;;  %v2902_v20 = vpop.f32.mrb[26].mxu1  ;;  %v1193_v23 = vpop.f32.mrb[28].mxu0  ;;  %v1298_v48 = vmul.f32 0.5, %v1190_v51 }
 0x305   : > { %v2904_v39 = vpop.f32.mrb[27].mxu1  ;;  %v1194_v6 = vadd.f32 %v1193_v23, %v2900_v56  ;;  %v1195_v15 = vpop.f32.mrb[29].mxu0  ;;  %2337 = verf.f32 %v1313_v52  ;;  %v1277_v3 = vadd.f32 %v2902_v20, %v2892_v16  ;;  %v1312_v33 = vmul.f32 0.70710677, %v1273_v5 }
 0x306   : > { %v1196_v21 = vadd.f32 %v1195_v15, %v2900_v56  ;;  %2339 = verf.f32 %v1314_v13  ;;  %v1279_v51 = vadd.f32 %v2904_v39, %v2892_v16 }
 0x307   : > { %v1317_v41 = vmul.f32 0.70710677, %v1194_v6  ;;  %v1301_v26 = vmul.f32 0.5, %v1194_v6  ;;  %v1315_v52 = vmul.f32 0.70710677, %v1277_v3 }
 0x308   : > { %v2908_v18 = vpop.f32.mrb[28].mxu1  ;;  %v1318_v31 = vmul.f32 0.70710677, %v1196_v21  ;;  %v1199_v17 = vpop.f32.mrb[30].mxu0  ;;  %v1302_v11 = vmul.f32 0.5, %v1196_v21 }
 0x309   : > { %v2912_v7 = vpop.f32.mrb[29].mxu1  ;;  %v1200_v61 = vadd.f32 %v1199_v17, %v2910_v29  ;;  %v1201_v32 = vpop.f32.mrb[31].mxu0  ;;  %2341 = verf.f32 %v1317_v41  ;;  %v1283_v13 = vadd.f32 %v2908_v18, %v2900_v56  ;;  %v1316_v23 = vmul.f32 0.70710677, %v1279_v51 }
 0x30a   : > { %v1202_v35 = vadd.f32 %v1201_v32, %v2910_v29  ;;  %2343 = verf.f32 %v1318_v31  ;;  %v1285_v58 = vadd.f32 %v2912_v7, %v2900_v56  ;;  %v1295_v7 = vmul.f32 0.5, %v1271_v9 }
 0x30b   : > { %v2334_v24 = vpop.eup %2333  ;;  %v1321_v14 = vmul.f32 0.70710677, %v1200_v61  ;;  %v1305_v59 = vmul.f32 0.5, %v1200_v61  ;;  %v1319_v40 = vmul.f32 0.70710677, %v1283_v13  ;;  %v1296_v17 = vmul.f32 0.5, %v1273_v5 }
 0x30c   : > { %v1288_v22 = vpop.f32.mrb[30].mxu1  ;;  %v2336_v0 = vpop.eup %2335  ;;  %v1341_v19 = vadd.f32 1.0, %v2334_v24  ;;  %v1322_v47 = vmul.f32 0.70710677, %v1202_v35  ;;  %v1306_v55 = vmul.f32 0.5, %v1202_v35 }
 0x30d   : > { %v1290_v10 = vpop.f32.mrb[31].mxu1  ;;  %v1342_v38 = vadd.f32 1.0, %v2336_v0  ;;  %2345 = verf.f32 %v1321_v14  ;;  %v1289_v37 = vadd.f32 %v1288_v22, %v2910_v29  ;;  %v1320_v20 = vmul.f32 0.70710677, %v1285_v58 }
 0x30e   : > { %v1357_v4 = vmul.f32 %v1341_v19, %v1293_v45  ;;  %2347 = verf.f32 %v1322_v47  ;;  %v1291_v6 = vadd.f32 %v1290_v10, %v2910_v29  ;;  %v1299_v0 = vmul.f32 0.5, %v1277_v3 }
 0x30f   : > { %v2338_v25 = vpop.eup %2337  ;;  %v1358_v60 = vmul.f32 %v1342_v38, %v1294_v12  ;;  %2349 = verf.f32 %v1311_v62  ;;  %v1323_v16 = vmul.f32 0.70710677, %v1289_v37  ;;  %v1300_v19 = vmul.f32 0.5, %v1279_v51 }
 0x310   : > { %v2340_v42 = vpop.eup %2339  ;;  %v1345_v53 = vadd.f32 1.0, %v2338_v25  ;;  %1373 = vxpose.xlu0.b32.start [1/4] (short) %v1357_v4, 128  ;;  %2351 = verf.f32 %v1312_v33  ;;  %v1324_v39 = vmul.f32 0.70710677, %v1291_v6  ;;  %v1303_v4 = vmul.f32 0.5, %v1283_v13 }
 0x311   : > { %v1346_v44 = vadd.f32 1.0, %v2340_v42  ;;  %1405 = vxpose.xlu1.b32.start [1/4] (short) %v1358_v60, 128  ;;  %2353 = verf.f32 %v1315_v52  ;;  %v1304_v25 = vmul.f32 0.5, %v1285_v58 }
 0x312   : > { %v1361_v27 = vmul.f32 %v1345_v53, %v1297_v43  ;;  %2355 = verf.f32 %v1316_v23 }
 0x313   : > { %v1362_v30 = vmul.f32 %v1346_v44, %v1298_v48  ;;  %v2342_v49 = vpop.eup %2341  ;;  %2357 = verf.f32 %v1319_v40  ;;  %v1307_v48 = vmul.f32 0.5, %v1289_v37  ;;  %v1308_v44 = vmul.f32 0.5, %v1291_v6 }
 0x314   : > { %1374 = vxpose.xlu0.b32.cont [2/4] (short) %v1361_v27, 128  ;;  %v2344_v28 = vpop.eup %2343  ;;  %v1349_v46 = vadd.f32 1.0, %v2342_v49  ;;  %2359 = verf.f32 %v1320_v20 }
 0x315   : > { %v1350_v50 = vadd.f32 1.0, %v2344_v28  ;;  %1406 = vxpose.xlu1.b32.cont [2/4] (short) %v1362_v30, 128  ;;  %2361 = verf.f32 %v1323_v16 }
 0x316   : > { %v1365_v54 = vmul.f32 %v1349_v46, %v1301_v26  ;;  %2363 = verf.f32 %v1324_v39 }
 0x317   : > { %v2346_v34 = vpop.eup %2345  ;;  %v1366_v57 = vmul.f32 %v1350_v50, %v1302_v11 }
 0x318   : > { %v2348_v36 = vpop.eup %2347  ;;  %v1353_v8 = vadd.f32 1.0, %v2346_v34  ;;  %1375 = vxpose.xlu0.b32.cont [3/4] (short) %v1365_v54, 128 }
 0x319   : > { %v1354_v2 = vadd.f32 1.0, %v2348_v36  ;;  %1407 = vxpose.xlu1.b32.cont [3/4] (short) %v1366_v57, 128  ;;  %v2350_v15 = vpop.eup %2349 }
 0x31a   : > { %v1369_v63 = vmul.f32 %v1353_v8, %v1305_v59  ;;  %v2352_v21 = vpop.eup %2351  ;;  %v1343_v18 = vadd.f32 1.0, %v2350_v15 }
 0x31b   : > { %v1370_v1 = vmul.f32 %v1354_v2, %v1306_v55  ;;  %v2354_v41 = vpop.eup %2353  ;;  %v1344_v31 = vadd.f32 1.0, %v2352_v21 }
 0x31c   : > { %1376 = vxpose.xlu0.b32.end [4/4] (short) %v1369_v63, 128  ;;  %v2356_v56 = vpop.eup %2355  ;;  %v1347_v61 = vadd.f32 1.0, %v2354_v41  ;;  %v1359_v32 = vmul.f32 %v1343_v18, %v1295_v7 }
 0x31d   : > { %1408 = vxpose.xlu1.b32.end [4/4] (short) %v1370_v1, 128  ;;  %v2358_v24 = vpop.eup %2357  ;;  %v1348_v35 = vadd.f32 1.0, %v2356_v56  ;;  %v1360_v22 = vmul.f32 %v1344_v31, %v1296_v17 }
 0x31e   : > { %v2360_v29 = vpop.eup %2359  ;;  %v1363_v10 = vmul.f32 %v1347_v61, %v1299_v0  ;;  %v1351_v45 = vadd.f32 1.0, %v2358_v24 }
 0x31f   : > { %v2362_v38 = vpop.eup %2361  ;;  %v1364_v14 = vmul.f32 %v1348_v35, %v1300_v19  ;;  %v1352_v47 = vadd.f32 1.0, %v2360_v29 }
 0x320   : > { %v2364_v12 = vpop.eup %2363  ;;  %v1367_v42 = vmul.f32 %v1351_v45, %v1303_v4  ;;  %v1355_v43 = vadd.f32 1.0, %v2362_v38 }
 0x321   : > { %v1368_v53 = vmul.f32 %v1352_v47, %v1304_v25  ;;  %v1356_v60 = vadd.f32 1.0, %v2364_v12 }
 0x322   : > { %v1371_v27 = vmul.f32 %v1355_v43, %v1307_v48 }
 0x323   : > { %v1372_v30 = vmul.f32 %v1356_v60, %v1308_v44 }
 0x34d   : > { %1437 = vxpose.xlu0.b32.start [1/4] (short) %v1359_v32, 128 }
 0x34e   : > { %1469 = vxpose.xlu1.b32.start [1/4] (short) %v1360_v22, 128 }
 0x351   : > { %1438 = vxpose.xlu0.b32.cont [2/4] (short) %v1363_v10, 128 }
 0x352   : > { %1470 = vxpose.xlu1.b32.cont [2/4] (short) %v1364_v14, 128 }
 0x355   : > { %1439 = vxpose.xlu0.b32.cont [3/4] (short) %v1367_v42, 128 }
 0x356   : > { %1471 = vxpose.xlu1.b32.cont [3/4] (short) %v1368_v53, 128 }
 0x359   : > { %1440 = vxpose.xlu0.b32.end [4/4] (short) %v1371_v27, 128 }
 0x35a   : > { %1472 = vxpose.xlu1.b32.end [4/4] (short) %v1372_v30, 128 }
 0x390   : > { %v1389_v49 = vpop.trf.xlu0 }
 0x391   : > { %v1421_v28 = vpop.trf.xlu1  ;;  %1501 = vst.msk [vmem:[%s2931_s13] sm:$0xff] %vm663_vm2, %v1389_v49 }
 0x392   : > { %1517 = vst.msk [vmem:[%s2931_s13 + $0x80] sm:$0xff] %vm663_vm2, %v1421_v28 }
 0x394   : > { %v1390_v26 = vpop.trf.xlu0 }
 0x395   : > { %v1422_v46 = vpop.trf.xlu1  ;;  %1502 = vst.msk [vmem:[%s2931_s13 + $0x8] sm:$0xff] %vm663_vm2, %v1390_v26 }
 0x396   : > { %1518 = vst.msk [vmem:[%s2931_s13 + $0x88] sm:$0xff] %vm663_vm2, %v1422_v46 }
 0x398   : > { %v1391_v11 = vpop.trf.xlu0 }
 0x399   : > { %v1423_v50 = vpop.trf.xlu1  ;;  %1503 = vst.msk [vmem:[%s2931_s13 + $0x10] sm:$0xff] %vm663_vm2, %v1391_v11 }
 0x39a   : > { %1519 = vst.msk [vmem:[%s2931_s13 + $0x90] sm:$0xff] %vm663_vm2, %v1423_v50 }
 0x39c   : > { %v1392_v54 = vpop.trf.xlu0 }
 0x39d   : > { %v1424_v34 = vpop.trf.xlu1  ;;  %1504 = vst.msk [vmem:[%s2931_s13 + $0x18] sm:$0xff] %vm663_vm2, %v1392_v54 }
 0x39e   : > { %1520 = vst.msk [vmem:[%s2931_s13 + $0x98] sm:$0xff] %vm663_vm2, %v1424_v34 }
 0x3a0   : > { %v1393_v57 = vpop.trf.xlu0 }
 0x3a1   : > { %v1425_v36 = vpop.trf.xlu1  ;;  %1505 = vst.msk [vmem:[%s2931_s13 + $0x20] sm:$0xff] %vm663_vm2, %v1393_v57 }
 0x3a2   : > { %1521 = vst.msk [vmem:[%s2931_s13 + $0xa0] sm:$0xff] %vm663_vm2, %v1425_v36 }
 0x3a4   : > { %v1394_v59 = vpop.trf.xlu0 }
 0x3a5   : > { %v1426_v8 = vpop.trf.xlu1  ;;  %1506 = vst.msk [vmem:[%s2931_s13 + $0x28] sm:$0xff] %vm663_vm2, %v1394_v59 }
 0x3a6   : > { %1522 = vst.msk [vmem:[%s2931_s13 + $0xa8] sm:$0xff] %vm663_vm2, %v1426_v8 }
 0x3a8   : > { %v1395_v55 = vpop.trf.xlu0 }
 0x3a9   : > { %v1427_v2 = vpop.trf.xlu1  ;;  %1507 = vst.msk [vmem:[%s2931_s13 + $0x30] sm:$0xff] %vm663_vm2, %v1395_v55 }
 0x3aa   : > { %1523 = vst.msk [vmem:[%s2931_s13 + $0xb0] sm:$0xff] %vm663_vm2, %v1427_v2 }
 0x3ac   : > { %v1396_v63 = vpop.trf.xlu0 }
 0x3ad   : > { %v1428_v1 = vpop.trf.xlu1  ;;  %1508 = vst.msk [vmem:[%s2931_s13 + $0x38] sm:$0xff] %vm663_vm2, %v1396_v63 }
 0x3ae   : > { %1524 = vst.msk [vmem:[%s2931_s13 + $0xb8] sm:$0xff] %vm663_vm2, %v1428_v1 }
 0x3b0   : > { %v1397_v9 = vpop.trf.xlu0 }
 0x3b1   : > { %v1429_v5 = vpop.trf.xlu1  ;;  %1509 = vst.msk [vmem:[%s2931_s13 + $0x40] sm:$0xff] %vm663_vm2, %v1397_v9 }
 0x3b2   : > { %1525 = vst.msk [vmem:[%s2931_s13 + $0xc0] sm:$0xff] %vm663_vm2, %v1429_v5 }
 0x3b4   : > { %v1398_v62 = vpop.trf.xlu0 }
 0x3b5   : > { %v1430_v3 = vpop.trf.xlu1  ;;  %1510 = vst.msk [vmem:[%s2931_s13 + $0x48] sm:$0xff] %vm663_vm2, %v1398_v62 }
 0x3b6   : > { %1526 = vst.msk [vmem:[%s2931_s13 + $0xc8] sm:$0xff] %vm663_vm2, %v1430_v3 }
 0x3b8   : > { %v1399_v33 = vpop.trf.xlu0 }
 0x3b9   : > { %v1431_v51 = vpop.trf.xlu1  ;;  %1511 = vst.msk [vmem:[%s2931_s13 + $0x50] sm:$0xff] %vm663_vm2, %v1399_v33 }
 0x3ba   : > { %1527 = vst.msk [vmem:[%s2931_s13 + $0xd0] sm:$0xff] %vm663_vm2, %v1431_v51 }
 0x3bc   : > { %v1400_v52 = vpop.trf.xlu0 }
 0x3bd   : > { %v1432_v13 = vpop.trf.xlu1  ;;  %1512 = vst.msk [vmem:[%s2931_s13 + $0x58] sm:$0xff] %vm663_vm2, %v1400_v52 }
 0x3be   : > { %1528 = vst.msk [vmem:[%s2931_s13 + $0xd8] sm:$0xff] %vm663_vm2, %v1432_v13 }
 0x3c0   : > { %v1401_v23 = vpop.trf.xlu0 }
 0x3c1   : > { %v1433_v58 = vpop.trf.xlu1  ;;  %1513 = vst.msk [vmem:[%s2931_s13 + $0x60] sm:$0xff] %vm663_vm2, %v1401_v23 }
 0x3c2   : > { %1529 = vst.msk [vmem:[%s2931_s13 + $0xe0] sm:$0xff] %vm663_vm2, %v1433_v58 }
 0x3c4   : > { %v1402_v40 = vpop.trf.xlu0 }
 0x3c5   : > { %v1434_v37 = vpop.trf.xlu1  ;;  %1514 = vst.msk [vmem:[%s2931_s13 + $0x68] sm:$0xff] %vm663_vm2, %v1402_v40 }
 0x3c6   : > { %1530 = vst.msk [vmem:[%s2931_s13 + $0xe8] sm:$0xff] %vm663_vm2, %v1434_v37 }
 0x3c8   : > { %v1403_v20 = vpop.trf.xlu0 }
 0x3c9   : > { %v1435_v6 = vpop.trf.xlu1  ;;  %1515 = vst.msk [vmem:[%s2931_s13 + $0x70] sm:$0xff] %vm663_vm2, %v1403_v20 }
 0x3ca   : > { %1531 = vst.msk [vmem:[%s2931_s13 + $0xf0] sm:$0xff] %vm663_vm2, %v1435_v6 }
 0x3cc   : > { %v1404_v16 = vpop.trf.xlu0 }
 0x3cd   : > { %v1436_v39 = vpop.trf.xlu1  ;;  %1516 = vst.msk [vmem:[%s2931_s13 + $0x78] sm:$0xff] %vm663_vm2, %v1404_v16 }
 0x3ce   : > { %1532 = vst.msk [vmem:[%s2931_s13 + $0xf8] sm:$0xff] %vm663_vm2, %v1436_v39 }
 0x3d0   : > { %v1453_v15 = vpop.trf.xlu0 }
 0x3d1   : > { %v1485_v21 = vpop.trf.xlu1  ;;  %1533 = vst.msk [vmem:[%s2931_s13 + $0x100] sm:$0xff] %vm663_vm2, %v1453_v15 }
 0x3d2   : > { %1549 = vst.msk [vmem:[%s2931_s13 + $0x180] sm:$0xff] %vm663_vm2, %v1485_v21 }
 0x3d4   : > { %v1454_v18 = vpop.trf.xlu0 }
 0x3d5   : > { %v1486_v41 = vpop.trf.xlu1  ;;  %1534 = vst.msk [vmem:[%s2931_s13 + $0x108] sm:$0xff] %vm663_vm2, %v1454_v18 }
 0x3d6   : > { %1550 = vst.msk [vmem:[%s2931_s13 + $0x188] sm:$0xff] %vm663_vm2, %v1486_v41 }
 0x3d8   : > { %v1455_v31 = vpop.trf.xlu0 }
 0x3d9   : > { %v1487_v56 = vpop.trf.xlu1  ;;  %1535 = vst.msk [vmem:[%s2931_s13 + $0x110] sm:$0xff] %vm663_vm2, %v1455_v31 }
 0x3da   : > { %1551 = vst.msk [vmem:[%s2931_s13 + $0x190] sm:$0xff] %vm663_vm2, %v1487_v56 }
 0x3dc   : > { %v1456_v7 = vpop.trf.xlu0 }
 0x3dd   : > { %v1488_v17 = vpop.trf.xlu1  ;;  %1536 = vst.msk [vmem:[%s2931_s13 + $0x118] sm:$0xff] %vm663_vm2, %v1456_v7 }
 0x3de   : > { %1552 = vst.msk [vmem:[%s2931_s13 + $0x198] sm:$0xff] %vm663_vm2, %v1488_v17 }
 0x3e0   : > { %v1457_v61 = vpop.trf.xlu0 }
 0x3e1   : > { %v1489_v32 = vpop.trf.xlu1  ;;  %1537 = vst.msk [vmem:[%s2931_s13 + $0x120] sm:$0xff] %vm663_vm2, %v1457_v61 }
 0x3e2   : > { %1553 = vst.msk [vmem:[%s2931_s13 + $0x1a0] sm:$0xff] %vm663_vm2, %v1489_v32 }
 0x3e4   : > { %v1458_v24 = vpop.trf.xlu0 }
 0x3e5   : > { %v1490_v35 = vpop.trf.xlu1  ;;  %1538 = vst.msk [vmem:[%s2931_s13 + $0x128] sm:$0xff] %vm663_vm2, %v1458_v24 }
 0x3e6   : > { %1554 = vst.msk [vmem:[%s2931_s13 + $0x1a8] sm:$0xff] %vm663_vm2, %v1490_v35 }
 0x3e8   : > { %v1459_v22 = vpop.trf.xlu0 }
 0x3e9   : > { %v1491_v29 = vpop.trf.xlu1  ;;  %1539 = vst.msk [vmem:[%s2931_s13 + $0x130] sm:$0xff] %vm663_vm2, %v1459_v22 }
 0x3ea   : > { %1555 = vst.msk [vmem:[%s2931_s13 + $0x1b0] sm:$0xff] %vm663_vm2, %v1491_v29 }
 0x3ec   : > { %v1460_v0 = vpop.trf.xlu0 }
 0x3ed   : > { %v1492_v19 = vpop.trf.xlu1  ;;  %1540 = vst.msk [vmem:[%s2931_s13 + $0x138] sm:$0xff] %vm663_vm2, %v1460_v0 }
 0x3ee   : > { %1556 = vst.msk [vmem:[%s2931_s13 + $0x1b8] sm:$0xff] %vm663_vm2, %v1492_v19 }
 0x3f0   : > { %v1461_v10 = vpop.trf.xlu0 }
 0x3f1   : > { %v1493_v45 = vpop.trf.xlu1  ;;  %1541 = vst.msk [vmem:[%s2931_s13 + $0x140] sm:$0xff] %vm663_vm2, %v1461_v10 }
 0x3f2   : > { %1557 = vst.msk [vmem:[%s2931_s13 + $0x1c0] sm:$0xff] %vm663_vm2, %v1493_v45 }
 0x3f4   : > { %v1462_v38 = vpop.trf.xlu0 }
 0x3f5   : > { %v1494_v14 = vpop.trf.xlu1  ;;  %1542 = vst.msk [vmem:[%s2931_s13 + $0x148] sm:$0xff] %vm663_vm2, %v1462_v38 }
 0x3f6   : > { %1558 = vst.msk [vmem:[%s2931_s13 + $0x1c8] sm:$0xff] %vm663_vm2, %v1494_v14 }
 0x3f8   : > { %v1463_v47 = vpop.trf.xlu0 }
 0x3f9   : > { %v1495_v12 = vpop.trf.xlu1  ;;  %1543 = vst.msk [vmem:[%s2931_s13 + $0x150] sm:$0xff] %vm663_vm2, %v1463_v47 }
 0x3fa   : > { %1559 = vst.msk [vmem:[%s2931_s13 + $0x1d0] sm:$0xff] %vm663_vm2, %v1495_v12 }
 0x3fc   : > { %v1464_v4 = vpop.trf.xlu0 }
 0x3fd   : > { %v1496_v25 = vpop.trf.xlu1  ;;  %1544 = vst.msk [vmem:[%s2931_s13 + $0x158] sm:$0xff] %vm663_vm2, %v1464_v4 }
 0x3fe   : > { %1560 = vst.msk [vmem:[%s2931_s13 + $0x1d8] sm:$0xff] %vm663_vm2, %v1496_v25 }
 0x400   : > { %v1465_v42 = vpop.trf.xlu0 }
 0x401   : > { %v1497_v43 = vpop.trf.xlu1  ;;  %1545 = vst.msk [vmem:[%s2931_s13 + $0x160] sm:$0xff] %vm663_vm2, %v1465_v42 }
 0x402   : > { %1561 = vst.msk [vmem:[%s2931_s13 + $0x1e0] sm:$0xff] %vm663_vm2, %v1497_v43 }
 0x404   : > { %v1466_v53 = vpop.trf.xlu0 }
 0x405   : > { %v1498_v60 = vpop.trf.xlu1  ;;  %1546 = vst.msk [vmem:[%s2931_s13 + $0x168] sm:$0xff] %vm663_vm2, %v1466_v53 }
 0x406   : > { %1562 = vst.msk [vmem:[%s2931_s13 + $0x1e8] sm:$0xff] %vm663_vm2, %v1498_v60 }
 0x408   : > { %v1467_v48 = vpop.trf.xlu0  ;;  %1571 = sbr.rel (!%p2521_p4) target bundleno = 1111 (0x457), region = 52 }
 0x409   : > { %v1499_v44 = vpop.trf.xlu1  ;;  %1547 = vst.msk [vmem:[%s2931_s13 + $0x170] sm:$0xff] %vm663_vm2, %v1467_v48 }
 0x40a   : > { %1563 = vst.msk [vmem:[%s2931_s13 + $0x1f0] sm:$0xff] %vm663_vm2, %v1499_v44 }
 0x40c   : > { %v1468_v27 = vpop.trf.xlu0 }
 0x40d   : > { %v1500_v30 = vpop.trf.xlu1  ;;  %1548 = vst.msk [vmem:[%s2931_s13 + $0x178] sm:$0xff] %vm663_vm2, %v1468_v27 }
 0x40e   : > { %1564 = vst.msk [vmem:[%s2931_s13 + $0x1f8] sm:$0xff] %vm663_vm2, %v1500_v30 }
 0x40f   : > { %s3287_s15 = smov (!%p1574_p8, %s1573_s15), 64 }
 0x410   : > { %s2077_s19 = sshll.u32 %s3287_s15, 7 }
 0x411   : > { %p2080_p9 = scmp.eq.s32.totalorder %s2077_s19, 0 }
 0x412   : > { %s3074_s9 = sshrl.u32 (!%p2080_p9), %s3287_s15, 6 }
 0x413   : > { %1582 = sbr.rel (%p2080_p9) target bundleno = 1111 (0x457), region = 56  ;;  %p2081_p10 = scmp.le.s32.totalorder (!%p2080_p9), %s3074_s9, 0 }
 0x41a   : > { %1988 = sbr.rel (%p2081_p10) target bundleno = 1090 (0x442), region = 132  ;;  %s3276_s27 = smov (!%p2081_p10), %s3068_s18 }
 0x41b   : > { %s3277_s20 = smov (!%p2081_p10), %s2931_s13  ;;  %s3083_s21 = smov (!%p2081_p10), 0  }
 0x41c   : > { %s3085_s22 = smov (!%p2081_p10), 0  }
 0x421 LB: >> { %v1770_v49 = vld [vmem:[%s2427_s20] sm:$0xff]  ;;  %v1772_v28 = vld [vmem:[%s2427_s20 + $0x8] sm:$0xff]  ;;  %v1774_v26 = vld [vmem:[%s2427_s20 + $0x10] sm:$0xff]  ;;  %s1898_s23 = sadd.s32 1, %s2431_s21  ;;  %s1764_s22 = sadd.s32 1, %s2435_s22   ;;  %s2435_s22 = sphi %s3085_s22, %s1764_s22   ;;  %s2431_s21 = sphi %s3083_s21, %s3280_s21   ;;  %s2427_s20 = sphi %s3277_s20, %s3279_s20   ;;  %s2423_s27 = sphi %s3276_s27, %s3278_s27  }
 0x422   : >> { %1771 = vst [vmem:[%s2423_s27] sm:$0xff] %v1770_v49  ;;  %1773 = vst [vmem:[%s2423_s27 + $0x8] sm:$0xff] %v1772_v28  ;;  %v1776_v46 = vld [vmem:[%s2427_s20 + $0x18] sm:$0xff]  ;;  %v1778_v11 = vld [vmem:[%s2427_s20 + $0x20] sm:$0xff]  ;;  %p1899_p11 = scmp.ge.s32.totalorder %s1898_s23, %s3074_s9  ;;  %p1763_p12 = scmp.ge.s32.totalorder %s1764_s22, %s3074_s9 }
 0x423   : >> { %1775 = vst [vmem:[%s2423_s27 + $0x10] sm:$0xff] %v1774_v26  ;;  %v1780_v50 = vld [vmem:[%s2427_s20 + $0x28] sm:$0xff]  ;;  %1777 = vst [vmem:[%s2423_s27 + $0x18] sm:$0xff] %v1776_v46  ;;  %v1782_v54 = vld [vmem:[%s2427_s20 + $0x30] sm:$0xff] }
 0x424   : >> { %1779 = vst [vmem:[%s2423_s27 + $0x20] sm:$0xff] %v1778_v11  ;;  %1781 = vst [vmem:[%s2423_s27 + $0x28] sm:$0xff] %v1780_v50  ;;  %v1784_v34 = vld [vmem:[%s2427_s20 + $0x38] sm:$0xff]  ;;  %v1786_v57 = vld [vmem:[%s2427_s20 + $0x40] sm:$0xff]  ;;  %s3289_s23 = smov (%p1899_p11, %s1898_s23), 0 }
 0x425   : >> { %1783 = vst [vmem:[%s2423_s27 + $0x30] sm:$0xff] %v1782_v54  ;;  %1785 = vst [vmem:[%s2423_s27 + $0x38] sm:$0xff] %v1784_v34  ;;  %v1788_v36 = vld [vmem:[%s2427_s20 + $0x48] sm:$0xff]  ;;  %v1790_v59 = vld [vmem:[%s2427_s20 + $0x50] sm:$0xff]  ;;  %s2082_s26 = sshll.u32 %s3289_s23, 9  ;;  %s3280_s21 = smov %s3289_s23 }
 0x426   : >> { %1787 = vst [vmem:[%s2423_s27 + $0x40] sm:$0xff] %v1786_v57  ;;  %v1792_v8 = vld [vmem:[%s2427_s20 + $0x58] sm:$0xff]  ;;  %1789 = vst [vmem:[%s2423_s27 + $0x48] sm:$0xff] %v1788_v36  ;;  %v1794_v55 = vld [vmem:[%s2427_s20 + $0x60] sm:$0xff]  ;;  %s3141_s29 = scalar_lea.vmem %s2931_s13, %s2082_s26 [#allocation2]   ;;  %s3144_s30 = scalar_lea.vmem %s3068_s18, %s2082_s26  }
 0x427   : >> { %1791 = vst [vmem:[%s2423_s27 + $0x50] sm:$0xff] %v1790_v59  ;;  %1793 = vst [vmem:[%s2423_s27 + $0x58] sm:$0xff] %v1792_v8  ;;  %v1796_v2 = vld [vmem:[%s2427_s20 + $0x68] sm:$0xff]  ;;  %v1798_v63 = vld [vmem:[%s2427_s20 + $0x70] sm:$0xff] }
 0x428   : >> { %1795 = vst [vmem:[%s2423_s27 + $0x60] sm:$0xff] %v1794_v55  ;;  %1797 = vst [vmem:[%s2423_s27 + $0x68] sm:$0xff] %v1796_v2  ;;  %v1800_v1 = vld [vmem:[%s2427_s20 + $0x78] sm:$0xff]  ;;  %v1802_v9 = vld [vmem:[%s2427_s20 + $0x80] sm:$0xff] }
 0x429   : >> { %1799 = vst [vmem:[%s2423_s27 + $0x70] sm:$0xff] %v1798_v63  ;;  %v1804_v5 = vld [vmem:[%s2427_s20 + $0x88] sm:$0xff]  ;;  %1801 = vst [vmem:[%s2423_s27 + $0x78] sm:$0xff] %v1800_v1  ;;  %v1806_v62 = vld [vmem:[%s2427_s20 + $0x90] sm:$0xff] }
 0x42a   : >> { %1803 = vst [vmem:[%s2423_s27 + $0x80] sm:$0xff] %v1802_v9  ;;  %1805 = vst [vmem:[%s2423_s27 + $0x88] sm:$0xff] %v1804_v5  ;;  %v1808_v3 = vld [vmem:[%s2427_s20 + $0x98] sm:$0xff]  ;;  %v1810_v33 = vld [vmem:[%s2427_s20 + $0xa0] sm:$0xff] }
 0x42b   : >> { %1807 = vst [vmem:[%s2423_s27 + $0x90] sm:$0xff] %v1806_v62  ;;  %1809 = vst [vmem:[%s2423_s27 + $0x98] sm:$0xff] %v1808_v3  ;;  %v1812_v51 = vld [vmem:[%s2427_s20 + $0xa8] sm:$0xff]  ;;  %v1814_v52 = vld [vmem:[%s2427_s20 + $0xb0] sm:$0xff] }
 0x42c   : >> { %1811 = vst [vmem:[%s2423_s27 + $0xa0] sm:$0xff] %v1810_v33  ;;  %v1816_v13 = vld [vmem:[%s2427_s20 + $0xb8] sm:$0xff]  ;;  %1813 = vst [vmem:[%s2423_s27 + $0xa8] sm:$0xff] %v1812_v51  ;;  %v1818_v23 = vld [vmem:[%s2427_s20 + $0xc0] sm:$0xff] }
 0x42d   : >> { %1815 = vst [vmem:[%s2423_s27 + $0xb0] sm:$0xff] %v1814_v52  ;;  %1817 = vst [vmem:[%s2423_s27 + $0xb8] sm:$0xff] %v1816_v13  ;;  %v1820_v58 = vld [vmem:[%s2427_s20 + $0xc8] sm:$0xff]  ;;  %v1822_v40 = vld [vmem:[%s2427_s20 + $0xd0] sm:$0xff] }
 0x42e   : >> { %1819 = vst [vmem:[%s2423_s27 + $0xc0] sm:$0xff] %v1818_v23  ;;  %1821 = vst [vmem:[%s2423_s27 + $0xc8] sm:$0xff] %v1820_v58  ;;  %v1824_v37 = vld [vmem:[%s2427_s20 + $0xd8] sm:$0xff]  ;;  %v1826_v20 = vld [vmem:[%s2427_s20 + $0xe0] sm:$0xff] }
 0x42f   : >> { %1823 = vst [vmem:[%s2423_s27 + $0xd0] sm:$0xff] %v1822_v40  ;;  %v1828_v6 = vld [vmem:[%s2427_s20 + $0xe8] sm:$0xff]  ;;  %1825 = vst [vmem:[%s2423_s27 + $0xd8] sm:$0xff] %v1824_v37  ;;  %v1830_v16 = vld [vmem:[%s2427_s20 + $0xf0] sm:$0xff] }
 0x430   : >> { %1827 = vst [vmem:[%s2423_s27 + $0xe0] sm:$0xff] %v1826_v20  ;;  %1829 = vst [vmem:[%s2423_s27 + $0xe8] sm:$0xff] %v1828_v6  ;;  %v1832_v39 = vld [vmem:[%s2427_s20 + $0xf8] sm:$0xff]  ;;  %v1834_v15 = vld [vmem:[%s2427_s20 + $0x100] sm:$0xff] }
 0x431   : >> { %1831 = vst [vmem:[%s2423_s27 + $0xf0] sm:$0xff] %v1830_v16  ;;  %1833 = vst [vmem:[%s2423_s27 + $0xf8] sm:$0xff] %v1832_v39  ;;  %v1836_v21 = vld [vmem:[%s2427_s20 + $0x108] sm:$0xff]  ;;  %v1838_v18 = vld [vmem:[%s2427_s20 + $0x110] sm:$0xff] }
 0x432   : >> { %1835 = vst [vmem:[%s2423_s27 + $0x100] sm:$0xff] %v1834_v15  ;;  %v1840_v41 = vld [vmem:[%s2427_s20 + $0x118] sm:$0xff]  ;;  %1837 = vst [vmem:[%s2423_s27 + $0x108] sm:$0xff] %v1836_v21  ;;  %v1842_v31 = vld [vmem:[%s2427_s20 + $0x120] sm:$0xff] }
 0x433   : >> { %1839 = vst [vmem:[%s2423_s27 + $0x110] sm:$0xff] %v1838_v18  ;;  %1841 = vst [vmem:[%s2423_s27 + $0x118] sm:$0xff] %v1840_v41  ;;  %v1844_v56 = vld [vmem:[%s2427_s20 + $0x128] sm:$0xff]  ;;  %v1846_v7 = vld [vmem:[%s2427_s20 + $0x130] sm:$0xff] }
 0x434   : >> { %1843 = vst [vmem:[%s2423_s27 + $0x120] sm:$0xff] %v1842_v31  ;;  %1845 = vst [vmem:[%s2423_s27 + $0x128] sm:$0xff] %v1844_v56  ;;  %v1848_v17 = vld [vmem:[%s2427_s20 + $0x138] sm:$0xff]  ;;  %v1850_v61 = vld [vmem:[%s2427_s20 + $0x140] sm:$0xff] }
 0x435   : >> { %1847 = vst [vmem:[%s2423_s27 + $0x130] sm:$0xff] %v1846_v7  ;;  %v1852_v32 = vld [vmem:[%s2427_s20 + $0x148] sm:$0xff]  ;;  %1849 = vst [vmem:[%s2423_s27 + $0x138] sm:$0xff] %v1848_v17  ;;  %v1854_v24 = vld [vmem:[%s2427_s20 + $0x150] sm:$0xff] }
 0x436   : >> { %1851 = vst [vmem:[%s2423_s27 + $0x140] sm:$0xff] %v1850_v61  ;;  %1853 = vst [vmem:[%s2423_s27 + $0x148] sm:$0xff] %v1852_v32  ;;  %v1856_v35 = vld [vmem:[%s2427_s20 + $0x158] sm:$0xff]  ;;  %v1858_v22 = vld [vmem:[%s2427_s20 + $0x160] sm:$0xff] }
 0x437   : >> { %1855 = vst [vmem:[%s2423_s27 + $0x150] sm:$0xff] %v1854_v24  ;;  %1857 = vst [vmem:[%s2423_s27 + $0x158] sm:$0xff] %v1856_v35  ;;  %v1860_v29 = vld [vmem:[%s2427_s20 + $0x168] sm:$0xff]  ;;  %v1862_v0 = vld [vmem:[%s2427_s20 + $0x170] sm:$0xff] }
 0x438   : >> { %1859 = vst [vmem:[%s2423_s27 + $0x160] sm:$0xff] %v1858_v22  ;;  %v1864_v19 = vld [vmem:[%s2427_s20 + $0x178] sm:$0xff]  ;;  %1861 = vst [vmem:[%s2423_s27 + $0x168] sm:$0xff] %v1860_v29  ;;  %v1866_v10 = vld [vmem:[%s2427_s20 + $0x180] sm:$0xff] }
 0x439   : >> { %1863 = vst [vmem:[%s2423_s27 + $0x170] sm:$0xff] %v1862_v0  ;;  %1865 = vst [vmem:[%s2423_s27 + $0x178] sm:$0xff] %v1864_v19  ;;  %v1868_v45 = vld [vmem:[%s2427_s20 + $0x188] sm:$0xff]  ;;  %v1870_v38 = vld [vmem:[%s2427_s20 + $0x190] sm:$0xff] }
 0x43a   : >> { %1867 = vst [vmem:[%s2423_s27 + $0x180] sm:$0xff] %v1866_v10  ;;  %1869 = vst [vmem:[%s2423_s27 + $0x188] sm:$0xff] %v1868_v45  ;;  %v1872_v14 = vld [vmem:[%s2427_s20 + $0x198] sm:$0xff]  ;;  %v1874_v47 = vld [vmem:[%s2427_s20 + $0x1a0] sm:$0xff] }
 0x43b   : >> { %1871 = vst [vmem:[%s2423_s27 + $0x190] sm:$0xff] %v1870_v38  ;;  %v1876_v12 = vld [vmem:[%s2427_s20 + $0x1a8] sm:$0xff]  ;;  %1873 = vst [vmem:[%s2423_s27 + $0x198] sm:$0xff] %v1872_v14  ;;  %v1878_v4 = vld [vmem:[%s2427_s20 + $0x1b0] sm:$0xff]  ;;  %1766 = sbr.rel (!%p1763_p12) target bundleno = 1057 (0x421), region = 138 }
 0x43c   : >> { %1875 = vst [vmem:[%s2423_s27 + $0x1a0] sm:$0xff] %v1874_v47  ;;  %1877 = vst [vmem:[%s2423_s27 + $0x1a8] sm:$0xff] %v1876_v12  ;;  %v1880_v25 = vld [vmem:[%s2427_s20 + $0x1b8] sm:$0xff]  ;;  %v1882_v42 = vld [vmem:[%s2427_s20 + $0x1c0] sm:$0xff] }
 0x43d   : >> { %1879 = vst [vmem:[%s2423_s27 + $0x1b0] sm:$0xff] %v1878_v4  ;;  %1881 = vst [vmem:[%s2423_s27 + $0x1b8] sm:$0xff] %v1880_v25  ;;  %v1884_v43 = vld [vmem:[%s2427_s20 + $0x1c8] sm:$0xff]  ;;  %v1886_v53 = vld [vmem:[%s2427_s20 + $0x1d0] sm:$0xff] }
 0x43e   : >> { %1883 = vst [vmem:[%s2423_s27 + $0x1c0] sm:$0xff] %v1882_v42  ;;  %v1888_v60 = vld [vmem:[%s2427_s20 + $0x1d8] sm:$0xff]  ;;  %1885 = vst [vmem:[%s2423_s27 + $0x1c8] sm:$0xff] %v1884_v43  ;;  %v1890_v48 = vld [vmem:[%s2427_s20 + $0x1e0] sm:$0xff] }
 0x43f   : >> { %1887 = vst [vmem:[%s2423_s27 + $0x1d0] sm:$0xff] %v1886_v53  ;;  %1889 = vst [vmem:[%s2423_s27 + $0x1d8] sm:$0xff] %v1888_v60  ;;  %v1892_v44 = vld [vmem:[%s2427_s20 + $0x1e8] sm:$0xff]  ;;  %v1894_v27 = vld [vmem:[%s2427_s20 + $0x1f0] sm:$0xff] }
 0x440   : >> { %1891 = vst [vmem:[%s2423_s27 + $0x1e0] sm:$0xff] %v1890_v48  ;;  %1893 = vst [vmem:[%s2423_s27 + $0x1e8] sm:$0xff] %v1892_v44  ;;  %v1896_v30 = vld [vmem:[%s2427_s20 + $0x1f8] sm:$0xff]  ;;  %s3279_s20 = smov %s3141_s29 }
 0x441   : >> { %1895 = vst [vmem:[%s2423_s27 + $0x1f0] sm:$0xff] %v1894_v27  ;;  %1897 = vst [vmem:[%s2423_s27 + $0x1f8] sm:$0xff] %v1896_v30  ;;  %s3278_s27 = smov %s3144_s30 }
 0x442 PF: > { %s3249_s10 = sand.u32 63, %s3287_s15   ;;  %s2093_s11 = sshll.u32 %s3074_s9, 9 }
 0x443   : > { %s1909_s12 = scalar_lea.vmem %s2931_s13, %s2093_s11 [#allocation2]   ;;  %s1911_s24 = scalar_lea.vmem %s3068_s18, %s2093_s11  }
 0x444   : > { %p2087_p13 = scmp.le.s32.totalorder %s3249_s10, 0 }
 0x445   : > { %s2437_s14 = smov (!%p2087_p13), %s1911_s24   ;;  %s2441_s16 = smov (!%p2087_p13), %s1909_s12  }
 0x446   : > { %2002 = sbr.rel (%p2087_p13) target bundleno = 1111 (0x457), region = 143  ;;  %s2445_s17 = smov (!%p2087_p13), 0  }
 0x447   : > { %s2449_s19 = smov (!%p2087_p13), 0  }
 0x44d LB: >> { %v1921_v49 = vld [vmem:[%s2443_s16] sm:$0xff]  ;;  %s1923_s15 = sadd.s32 1, %s2447_s17  ;;  %s1915_s19 = sadd.s32 1, %s2451_s19   ;;  %s2451_s19 = sphi %s2449_s19, %s1915_s19   ;;  %s2447_s17 = sphi %s2445_s17, %s2446_s17   ;;  %s2443_s16 = sphi %s2441_s16, %s1928_s16   ;;  %s2439_s14 = sphi %s2437_s14, %s1929_s14  }
 0x44e   : >> { %1922 = vst [vmem:[%s2439_s14] sm:$0xff] %v1921_v49  ;;  %p1924_p0 = scmp.ge.s32.totalorder %s1923_s15, %s3249_s10  ;;  %p1914_p1 = scmp.ge.s32.totalorder %s1915_s19, %s3249_s10 }
 0x450   : >> { %s3291_s15 = smov (%p1924_p0, %s1923_s15), 0  ;;  %1917 = sbr.rel (!%p1914_p1) target bundleno = 1101 (0x44d), region = 149 }
 0x451   : >> { %s2088_s13 = sshll.u32 %s3291_s15, 3  ;;  %s2446_s17 = smov %s3291_s15  }
 0x452   : >> { %s1928_s16 = scalar_lea.vmem %s1909_s12, %s2088_s13 [#allocation2]   ;;  %s1929_s14 = scalar_lea.vmem %s1911_s24, %s2088_s13  }
 0x457 PF: > { %p14_p2 = scmp.ge.s32.totalorder %s2511_s28, 4   ;;  %s3281_s24 = smov %s2415_s25 }
 0x458   : > { %s3282_s25 = smov %s2519_s8  ;;  %s3283_s26 = smov %s2511_s28 }
 0x459   :  { %16 = sbr.rel (!%p14_p2) target bundleno = 2 (0x2), region = 160 }

</bundles_post_ra>
